<compile_context>
chip_gen: v7x
topology: tpu7x:2x2x1
jax: 0.10.0
libtpu: 0.0.40
codegen_flags: <defaults>
</compile_context>

<pallas_src>
import functools

import jax
import jax.numpy as jnp
from jax.experimental import pallas as pl
from jax.experimental.pallas import tpu as pltpu

_LANES = 128                    # pad Cout up to a multiple of the lane width
_TARGET_M = 512                 # target rows (th * Wrow) per MXU matmul
_VMEM_BLK_BUDGET = 6 * 1024 * 1024


def _round_up(x, m):
    return ((x + m - 1) // m) * m


# ---------------------------------------------------------------------------
# Pallas kernel: k*k large-M matmuls + fused BN scale/shift + SiLU.
# ---------------------------------------------------------------------------
def _conv_bn_silu_kernel(x_ref, w_ref, scale_ref, bias_ref, o_ref, *,
                         ksize, stride, wrow, m_out):
    # x_ref:     (1, flat_len, Cin)   bf16  flattened input band (row pitch = wrow)
    # w_ref:     (k*k, Cin, TCN)      bf16  conv weight, tap-major (kh, kw)
    # scale_ref: (1, TCN)             f32   folded BN scale = gamma/sqrt(var+eps)
    # bias_ref:  (1, TCN)             f32   folded BN bias  = beta - mean*scale
    # o_ref:     (1, m_out, TCN)      f32   flattened output band (same pitch)
    tcn = scale_ref.shape[-1]

    acc = jnp.zeros((m_out, tcn), jnp.float32)
    for kh in range(ksize):
        for kw in range(ksize):
            off = kh * wrow + kw
            if stride == 1:
                tap = x_ref[0, off:off + m_out, :]               # (m_out, Cin)
            else:
                tap = x_ref[0, pl.ds(off, m_out, stride), :]     # strided taps
            acc = acc + jnp.dot(tap, w_ref[kh * ksize + kw],
                                preferred_element_type=jnp.float32)

    y = acc * scale_ref[...] + bias_ref[...]                     # fused BN (f32)
    y = y * jax.nn.sigmoid(y)                                    # SiLU (f32)
    o_ref[0] = y.astype(o_ref.dtype)                             # one full vst


# ---------------------------------------------------------------------------
# BaseConv forward (glue: layout, padding, banding, BN folding).
# ---------------------------------------------------------------------------
def base_conv_forward(x_nchw, conv_weight, gamma, beta, running_mean,
                      running_var, *, ksize, stride, eps=1e-5):
    """x_nchw: [N, Cin, H, W]; conv_weight: [Cout, Cin, kh, kw] (PyTorch layout).

    Returns [N, Cout, Ho, Wo] matching
    SiLU(BatchNorm2d(Conv2d(x, ksize, stride, pad=(ksize-1)//2, bias=False))).
    """
    # TODO(synk): groups > 1 (grouped / depthwise conv) not implemented; groups=1 only.
    N, Cin, H, W = x_nchw.shape
    Cout = conv_weight.shape[0]
    pad = (ksize - 1) // 2
    Ho = (H + 2 * pad - ksize) // stride + 1
    Wo = (W + 2 * pad - ksize) // stride + 1
    Wp = W + 2 * pad
    wrow = _round_up(Wp, 8)                     # row pitch (keeps m_out % 8 == 0)
    cpad = _round_up(Cout, _LANES)              # lane-dense output channels
    tcn = 256 if cpad % 256 == 0 else _LANES    # Cout tile per grid step
    n_ct = cpad // tcn

    # Output rows per band: as big as possible (large MXU M-tile, few grid
    # steps) while the double-buffered blocks stay comfortably in VMEM.
    th = min(Ho, max(1, _TARGET_M // wrow))
    while th > 1:
        rows_in = (th - 1) * stride + ksize
        if (rows_in * wrow * Cin * 2 <= _VMEM_BLK_BUDGET
                and th * wrow * tcn * 4 <= _VMEM_BLK_BUDGET):
            break
        th -= 1
    rows_in = (th - 1) * stride + ksize
    n_bands = -(-Ho // th)
    g = N * n_bands
    m_out = th * wrow

    # Flat band length: must also cover the reads of the discarded pitch
    # columns (they read a few zero-padded elements past the last real row).
    flat_have = rows_in * wrow
    flat_need = stride * (m_out - 1) + (ksize - 1) * wrow + (ksize - 1) + 1
    flat_len = _round_up(max(flat_have, flat_need), 8)

    # NCHW -> NHWC, cast to bf16 (MXU operand dtype), zero-pad H/W.
    # TODO(synk): the NCHW<->NHWC transposes stay outside the kernel to preserve
    # the PyTorch NCHW interface; an NHWC-native graph would drop both of them.
    h_need = (n_bands - 1) * th * stride + rows_in
    extra_rows = max(0, h_need - (H + 2 * pad))
    x = jnp.transpose(x_nchw, (0, 2, 3, 1)).astype(jnp.bfloat16)
    x = jnp.pad(x, ((0, 0), (pad, pad + extra_rows),
                    (pad, wrow - Wp + pad), (0, 0)))          # (N, h_need.., wrow, Cin)

    # Band along H (each band carries its halo rows), then flatten to 2-D.
    if n_bands == 1:
        xb = x[:, :rows_in]                                   # (N, rows_in, wrow, Cin)
    else:
        xb = jnp.stack([x[:, b * th * stride: b * th * stride + rows_in]
                        for b in range(n_bands)], axis=1)
        xb = xb.reshape(g, rows_in, wrow, Cin)
    xb = xb.reshape(g, rows_in * wrow, Cin)
    xb = jnp.pad(xb, ((0, 0), (0, flat_len - rows_in * wrow), (0, 0)))

    # Conv weight [Cout, Cin, kh, kw] -> tap-major (k*k, Cin, Cpad) bf16,
    # zero-padded output channels.
    w = jnp.transpose(conv_weight, (2, 3, 1, 0)).reshape(ksize * ksize, Cin, Cout)
    w = jnp.pad(w, ((0, 0), (0, 0), (0, cpad - Cout))).astype(jnp.bfloat16)

    # Fold BatchNorm (eval semantics) into per-channel scale/bias (f32).
    # Padded channels get scale = bias = 0 -> output exactly 0 (no NaN).
    scale = gamma / jnp.sqrt(running_var + eps)
    bias = beta - running_mean * scale
    scale = jnp.pad(scale, (0, cpad - Cout)).reshape(1, cpad).astype(jnp.float32)
    bias = jnp.pad(bias, (0, cpad - Cout)).reshape(1, cpad).astype(jnp.float32)

    kernel = functools.partial(_conv_bn_silu_kernel, ksize=ksize, stride=stride,
                               wrow=wrow, m_out=m_out)

    # Advisory cost estimate so XLA can schedule the surrounding transposes.
    flops = 2 * g * m_out * (ksize * ksize * Cin) * cpad
    transcendentals = g * m_out * cpad
    bytes_accessed = (xb.size * 2 + w.size * 2
                      + (scale.size + bias.size) * 4 + g * m_out * cpad * 4)

    # Explicit VMEM budget: double-buffered blocks + f32 accumulator + slack,
    # capped so it is safe on v7x's smaller physical VMEM.
    blk_bytes = (flat_len * Cin * 2 + ksize * ksize * Cin * tcn * 2
                 + 2 * tcn * 4 + m_out * tcn * 4)
    vmem_limit = int(min(48 * 1024 * 1024,
                         max(16 * 1024 * 1024,
                             2 * blk_bytes + 2 * m_out * tcn * 4 + (2 << 20))))

    out = pl.pallas_call(
        kernel,
        out_shape=jax.ShapeDtypeStruct((g, m_out, cpad), jnp.float32),
        grid_spec=pltpu.PrefetchScalarGridSpec(
            num_scalar_prefetch=0,
            grid=(g, n_ct),
            in_specs=[
                pl.BlockSpec((1, flat_len, Cin), lambda i, j: (i, 0, 0)),
                pl.BlockSpec((ksize * ksize, Cin, tcn), lambda i, j: (0, 0, j)),
                pl.BlockSpec((1, tcn), lambda i, j: (0, j)),
                pl.BlockSpec((1, tcn), lambda i, j: (0, j)),
            ],
            out_specs=pl.BlockSpec((1, m_out, tcn), lambda i, j: (i, 0, j)),
        ),
        compiler_params=pltpu.CompilerParams(
            dimension_semantics=("parallel", "parallel"),
            vmem_limit_bytes=vmem_limit,
        ),
        cost_estimate=pl.CostEstimate(
            flops=int(flops),
            transcendentals=int(transcendentals),
            bytes_accessed=int(bytes_accessed)),
    )(xb, w, scale, bias)

    # (G, TH*Wrow, Cpad) -> (N, n_bands*TH, Wrow, Cpad) -> valid window -> NCHW.
    out = out.reshape(N, n_bands * th, wrow, cpad)[:, :Ho, :Wo, :Cout]
    return jnp.transpose(out, (0, 3, 1, 2))


# ---------------------------------------------------------------------------
# Demo
# ---------------------------------------------------------------------------
if __name__ == "__main__":
    key = jax.random.PRNGKey(0)
    k_x, k_w, k_g, k_b, k_m, k_v = jax.random.split(key, 6)

    N, Cin, H, W = 2, 4, 16, 16
    Cout, ksize, stride = 8, 3, 1

    x = jax.random.normal(k_x, (N, Cin, H, W), dtype=jnp.float32)
    conv_weight = 0.1 * jax.random.normal(k_w, (Cout, Cin, ksize, ksize), dtype=jnp.float32)
    gamma = 1.0 + 0.1 * jax.random.normal(k_g, (Cout,), dtype=jnp.float32)
    beta = 0.1 * jax.random.normal(k_b, (Cout,), dtype=jnp.float32)
    running_mean = 0.05 * jax.random.normal(k_m, (Cout,), dtype=jnp.float32)
    running_var = jnp.abs(1.0 + 0.1 * jax.random.normal(k_v, (Cout,), dtype=jnp.float32))

    fwd = jax.jit(functools.partial(base_conv_forward, ksize=ksize, stride=stride))
    y = fwd(x, conv_weight, gamma, beta, running_mean, running_var)
    jax.block_until_ready(y)

    assert y.shape == (N, Cout, H, W), y.shape

    # Reference: same conv+BN+SiLU with the same bf16 operand rounding the
    # kernel uses (f32 accumulation everywhere), so tolerances stay tight.
    eps = 1e-5
    x_bf = x.astype(jnp.bfloat16).astype(jnp.float32)
    w_bf = conv_weight.astype(jnp.bfloat16).astype(jnp.float32)
    ref_conv = jax.lax.conv_general_dilated(
        x_bf, w_bf, window_strides=(stride, stride),
        padding=[((ksize - 1) // 2, (ksize - 1) // 2)] * 2,
        dimension_numbers=("NCHW", "OIHW", "NCHW"),
        precision=jax.lax.Precision.HIGHEST)
    scale_r = (gamma / jnp.sqrt(running_var + eps)).reshape(1, Cout, 1, 1)
    bias_r = (beta - running_mean * gamma / jnp.sqrt(running_var + eps)).reshape(1, Cout, 1, 1)
    ref = ref_conv * scale_r + bias_r
    ref = ref * jax.nn.sigmoid(ref)
    assert jnp.allclose(y, ref, atol=2e-3, rtol=2e-3), float(jnp.max(jnp.abs(y - ref)))

    print("KERNEL_OK")
</pallas_src>

<mosaic_0001>
module attributes {stable_mosaic.version = 11 : i64} {
  func.func @_conv_bn_silu_kernel(%arg0: i32, %arg1: i32, %arg2: memref<1x440x4xbf16, #tpu.memory_space<vmem>>, %arg3: memref<9x4x128xbf16, #tpu.memory_space<vmem>>, %arg4: memref<1x128xf32, #tpu.memory_space<vmem>>, %arg5: memref<1x128xf32, #tpu.memory_space<vmem>>, %arg6: memref<1x384x128xf32, #tpu.memory_space<vmem>>) attributes {dimension_semantics = [#tpu.dimension_semantics<parallel>, #tpu.dimension_semantics<parallel>], iteration_bounds = array<i64: 2, 1>, scalar_prefetch = 0 : i64, scratch_operands = 0 : i64, tpu.core_type = #tpu.core_type<tc>, window_params = [{transform_indices = @transform_0, window_bounds = array<i64: 1, 440, 4>}, {transform_indices = @transform_1, window_bounds = array<i64: 9, 4, 128>}, {transform_indices = @transform_2, window_bounds = array<i64: 1, 128>}, {transform_indices = @transform_3, window_bounds = array<i64: 1, 128>}, {transform_indices = @transform_4, window_bounds = array<i64: 1, 384, 128>}]} {
    %cst = arith.constant 0.000000e+00 : f32
    %0 = vector.broadcast %cst : f32 to vector<384x128xf32>
    %c0 = arith.constant 0 : index
    %c0_0 = arith.constant 0 : index
    %c0_1 = arith.constant 0 : index
    %1 = vector.load %arg2[%c0, %c0_0, %c0_1] : memref<1x440x4xbf16, #tpu.memory_space<vmem>>, vector<1x384x4xbf16>
    %2 = vector.shape_cast %1 : vector<1x384x4xbf16> to vector<384x4xbf16>
    %c0_2 = arith.constant 0 : index
    %c0_3 = arith.constant 0 : index
    %c0_4 = arith.constant 0 : index
    %3 = vector.load %arg3[%c0_2, %c0_3, %c0_4] : memref<9x4x128xbf16, #tpu.memory_space<vmem>>, vector<1x4x128xbf16>
    %4 = vector.shape_cast %3 : vector<1x4x128xbf16> to vector<4x128xbf16>
    %cst_5 = arith.constant dense<0.000000e+00> : vector<384x128xf32>
    %5 = tpu.matmul %2, %4, %cst_5 {dimension_numbers = #tpu.dot_dimension_numbers<[1], [0], [0], [1], [0, 0, 1, 1], [], []>} : vector<384x4xbf16>, vector<4x128xbf16>, vector<384x128xf32> -> vector<384x128xf32>
    %6 = arith.addf %0, %5 : vector<384x128xf32>
    %c0_6 = arith.constant 0 : index
    %c1 = arith.constant 1 : index
    %c0_7 = arith.constant 0 : index
    %7 = vector.load %arg2[%c0_6, %c1, %c0_7] : memref<1x440x4xbf16, #tpu.memory_space<vmem>>, vector<1x384x4xbf16>
    %8 = vector.shape_cast %7 : vector<1x384x4xbf16> to vector<384x4xbf16>
    %c1_8 = arith.constant 1 : index
    %c0_9 = arith.constant 0 : index
    %c0_10 = arith.constant 0 : index
    %9 = vector.load %arg3[%c1_8, %c0_9, %c0_10] : memref<9x4x128xbf16, #tpu.memory_space<vmem>>, vector<1x4x128xbf16>
    %10 = vector.shape_cast %9 : vector<1x4x128xbf16> to vector<4x128xbf16>
    %cst_11 = arith.constant dense<0.000000e+00> : vector<384x128xf32>
    %11 = tpu.matmul %8, %10, %cst_11 {dimension_numbers = #tpu.dot_dimension_numbers<[1], [0], [0], [1], [0, 0, 1, 1], [], []>} : vector<384x4xbf16>, vector<4x128xbf16>, vector<384x128xf32> -> vector<384x128xf32>
    %12 = arith.addf %6, %11 : vector<384x128xf32>
    %c0_12 = arith.constant 0 : index
    %c2 = arith.constant 2 : index
    %c0_13 = arith.constant 0 : index
    %13 = vector.load %arg2[%c0_12, %c2, %c0_13] : memref<1x440x4xbf16, #tpu.memory_space<vmem>>, vector<1x384x4xbf16>
    %14 = vector.shape_cast %13 : vector<1x384x4xbf16> to vector<384x4xbf16>
    %c2_14 = arith.constant 2 : index
    %c0_15 = arith.constant 0 : index
    %c0_16 = arith.constant 0 : index
    %15 = vector.load %arg3[%c2_14, %c0_15, %c0_16] : memref<9x4x128xbf16, #tpu.memory_space<vmem>>, vector<1x4x128xbf16>
    %16 = vector.shape_cast %15 : vector<1x4x128xbf16> to vector<4x128xbf16>
    %cst_17 = arith.constant dense<0.000000e+00> : vector<384x128xf32>
    %17 = tpu.matmul %14, %16, %cst_17 {dimension_numbers = #tpu.dot_dimension_numbers<[1], [0], [0], [1], [0, 0, 1, 1], [], []>} : vector<384x4xbf16>, vector<4x128xbf16>, vector<384x128xf32> -> vector<384x128xf32>
    %18 = arith.addf %12, %17 : vector<384x128xf32>
    %c0_18 = arith.constant 0 : index
    %c24 = arith.constant 24 : index
    %c0_19 = arith.constant 0 : index
    %19 = vector.load %arg2[%c0_18, %c24, %c0_19] : memref<1x440x4xbf16, #tpu.memory_space<vmem>>, vector<1x384x4xbf16>
    %20 = vector.shape_cast %19 : vector<1x384x4xbf16> to vector<384x4xbf16>
    %c3 = arith.constant 3 : index
    %c0_20 = arith.constant 0 : index
    %c0_21 = arith.constant 0 : index
    %21 = vector.load %arg3[%c3, %c0_20, %c0_21] : memref<9x4x128xbf16, #tpu.memory_space<vmem>>, vector<1x4x128xbf16>
    %22 = vector.shape_cast %21 : vector<1x4x128xbf16> to vector<4x128xbf16>
    %cst_22 = arith.constant dense<0.000000e+00> : vector<384x128xf32>
    %23 = tpu.matmul %20, %22, %cst_22 {dimension_numbers = #tpu.dot_dimension_numbers<[1], [0], [0], [1], [0, 0, 1, 1], [], []>} : vector<384x4xbf16>, vector<4x128xbf16>, vector<384x128xf32> -> vector<384x128xf32>
    %24 = arith.addf %18, %23 : vector<384x128xf32>
    %c0_23 = arith.constant 0 : index
    %c25 = arith.constant 25 : index
    %c0_24 = arith.constant 0 : index
    %25 = vector.load %arg2[%c0_23, %c25, %c0_24] : memref<1x440x4xbf16, #tpu.memory_space<vmem>>, vector<1x384x4xbf16>
    %26 = vector.shape_cast %25 : vector<1x384x4xbf16> to vector<384x4xbf16>
    %c4 = arith.constant 4 : index
    %c0_25 = arith.constant 0 : index
    %c0_26 = arith.constant 0 : index
    %27 = vector.load %arg3[%c4, %c0_25, %c0_26] : memref<9x4x128xbf16, #tpu.memory_space<vmem>>, vector<1x4x128xbf16>
    %28 = vector.shape_cast %27 : vector<1x4x128xbf16> to vector<4x128xbf16>
    %cst_27 = arith.constant dense<0.000000e+00> : vector<384x128xf32>
    %29 = tpu.matmul %26, %28, %cst_27 {dimension_numbers = #tpu.dot_dimension_numbers<[1], [0], [0], [1], [0, 0, 1, 1], [], []>} : vector<384x4xbf16>, vector<4x128xbf16>, vector<384x128xf32> -> vector<384x128xf32>
    %30 = arith.addf %24, %29 : vector<384x128xf32>
    %c0_28 = arith.constant 0 : index
    %c26 = arith.constant 26 : index
    %c0_29 = arith.constant 0 : index
    %31 = vector.load %arg2[%c0_28, %c26, %c0_29] : memref<1x440x4xbf16, #tpu.memory_space<vmem>>, vector<1x384x4xbf16>
    %32 = vector.shape_cast %31 : vector<1x384x4xbf16> to vector<384x4xbf16>
    %c5 = arith.constant 5 : index
    %c0_30 = arith.constant 0 : index
    %c0_31 = arith.constant 0 : index
    %33 = vector.load %arg3[%c5, %c0_30, %c0_31] : memref<9x4x128xbf16, #tpu.memory_space<vmem>>, vector<1x4x128xbf16>
    %34 = vector.shape_cast %33 : vector<1x4x128xbf16> to vector<4x128xbf16>
    %cst_32 = arith.constant dense<0.000000e+00> : vector<384x128xf32>
    %35 = tpu.matmul %32, %34, %cst_32 {dimension_numbers = #tpu.dot_dimension_numbers<[1], [0], [0], [1], [0, 0, 1, 1], [], []>} : vector<384x4xbf16>, vector<4x128xbf16>, vector<384x128xf32> -> vector<384x128xf32>
    %36 = arith.addf %30, %35 : vector<384x128xf32>
    %c0_33 = arith.constant 0 : index
    %c48 = arith.constant 48 : index
    %c0_34 = arith.constant 0 : index
    %37 = vector.load %arg2[%c0_33, %c48, %c0_34] : memref<1x440x4xbf16, #tpu.memory_space<vmem>>, vector<1x384x4xbf16>
    %38 = vector.shape_cast %37 : vector<1x384x4xbf16> to vector<384x4xbf16>
    %c6 = arith.constant 6 : index
    %c0_35 = arith.constant 0 : index
    %c0_36 = arith.constant 0 : index
    %39 = vector.load %arg3[%c6, %c0_35, %c0_36] : memref<9x4x128xbf16, #tpu.memory_space<vmem>>, vector<1x4x128xbf16>
    %40 = vector.shape_cast %39 : vector<1x4x128xbf16> to vector<4x128xbf16>
    %cst_37 = arith.constant dense<0.000000e+00> : vector<384x128xf32>
    %41 = tpu.matmul %38, %40, %cst_37 {dimension_numbers = #tpu.dot_dimension_numbers<[1], [0], [0], [1], [0, 0, 1, 1], [], []>} : vector<384x4xbf16>, vector<4x128xbf16>, vector<384x128xf32> -> vector<384x128xf32>
    %42 = arith.addf %36, %41 : vector<384x128xf32>
    %c0_38 = arith.constant 0 : index
    %c49 = arith.constant 49 : index
    %c0_39 = arith.constant 0 : index
    %43 = vector.load %arg2[%c0_38, %c49, %c0_39] : memref<1x440x4xbf16, #tpu.memory_space<vmem>>, vector<1x384x4xbf16>
    %44 = vector.shape_cast %43 : vector<1x384x4xbf16> to vector<384x4xbf16>
    %c7 = arith.constant 7 : index
    %c0_40 = arith.constant 0 : index
    %c0_41 = arith.constant 0 : index
    %45 = vector.load %arg3[%c7, %c0_40, %c0_41] : memref<9x4x128xbf16, #tpu.memory_space<vmem>>, vector<1x4x128xbf16>
    %46 = vector.shape_cast %45 : vector<1x4x128xbf16> to vector<4x128xbf16>
    %cst_42 = arith.constant dense<0.000000e+00> : vector<384x128xf32>
    %47 = tpu.matmul %44, %46, %cst_42 {dimension_numbers = #tpu.dot_dimension_numbers<[1], [0], [0], [1], [0, 0, 1, 1], [], []>} : vector<384x4xbf16>, vector<4x128xbf16>, vector<384x128xf32> -> vector<384x128xf32>
    %48 = arith.addf %42, %47 : vector<384x128xf32>
    %c0_43 = arith.constant 0 : index
    %c50 = arith.constant 50 : index
    %c0_44 = arith.constant 0 : index
    %49 = vector.load %arg2[%c0_43, %c50, %c0_44] : memref<1x440x4xbf16, #tpu.memory_space<vmem>>, vector<1x384x4xbf16>
    %50 = vector.shape_cast %49 : vector<1x384x4xbf16> to vector<384x4xbf16>
    %c8 = arith.constant 8 : index
    %c0_45 = arith.constant 0 : index
    %c0_46 = arith.constant 0 : index
    %51 = vector.load %arg3[%c8, %c0_45, %c0_46] : memref<9x4x128xbf16, #tpu.memory_space<vmem>>, vector<1x4x128xbf16>
    %52 = vector.shape_cast %51 : vector<1x4x128xbf16> to vector<4x128xbf16>
    %cst_47 = arith.constant dense<0.000000e+00> : vector<384x128xf32>
    %53 = tpu.matmul %50, %52, %cst_47 {dimension_numbers = #tpu.dot_dimension_numbers<[1], [0], [0], [1], [0, 0, 1, 1], [], []>} : vector<384x4xbf16>, vector<4x128xbf16>, vector<384x128xf32> -> vector<384x128xf32>
    %54 = arith.addf %48, %53 : vector<384x128xf32>
    %c0_48 = arith.constant 0 : index
    %c0_49 = arith.constant 0 : index
    %55 = vector.load %arg4[%c0_48, %c0_49] : memref<1x128xf32, #tpu.memory_space<vmem>>, vector<1x128xf32>
    %56 = vector.broadcast %55 : vector<1x128xf32> to vector<384x128xf32>
    %57 = arith.mulf %54, %56 : vector<384x128xf32>
    %c0_50 = arith.constant 0 : index
    %c0_51 = arith.constant 0 : index
    %58 = vector.load %arg5[%c0_50, %c0_51] : memref<1x128xf32, #tpu.memory_space<vmem>>, vector<1x128xf32>
    %59 = vector.broadcast %58 : vector<1x128xf32> to vector<384x128xf32>
    %60 = arith.addf %57, %59 : vector<384x128xf32>
    %61 = arith.negf %60 : vector<384x128xf32>
    %62 = math.exp %61 : vector<384x128xf32>
    %cst_52 = arith.constant 1.000000e+00 : f32
    %63 = vector.broadcast %cst_52 : f32 to vector<384x128xf32>
    %64 = arith.addf %63, %62 : vector<384x128xf32>
    %65 = arith.divf %63, %64 : vector<384x128xf32>
    %66 = arith.mulf %60, %65 : vector<384x128xf32>
    %c0_53 = arith.constant 0 : index
    %c0_54 = arith.constant 0 : index
    %c0_55 = arith.constant 0 : index
    %67 = vector.load %arg6[%c0_53, %c0_54, %c0_55] : memref<1x384x128xf32, #tpu.memory_space<vmem>>, vector<1x384x128xf32>
    %68 = vector.shape_cast %67 : vector<1x384x128xf32> to vector<384x128xf32>
    %69 = vector.shape_cast %66 : vector<384x128xf32> to vector<1x384x128xf32>
    tpu.vector_store %arg6[%c0_53, %c0_54, %c0_55], %69 {strides = array<i32>} : memref<1x384x128xf32, #tpu.memory_space<vmem>>, vector<1x384x128xf32>,
    return
  }
  func.func @transform_0(%arg0: i32, %arg1: i32) -> (i32, i32, i32) {
    %c0_i32 = arith.constant 0 : i32
    %c0_i32_0 = arith.constant 0 : i32
    %c0_i32_1 = arith.constant 0 : i32
    return %arg0, %c0_i32, %c0_i32_0 : i32, i32, i32
  }
  func.func @transform_1(%arg0: i32, %arg1: i32) -> (i32, i32, i32) {
    %c0_i32 = arith.constant 0 : i32
    %c0_i32_0 = arith.constant 0 : i32
    %c0_i32_1 = arith.constant 0 : i32
    return %c0_i32, %c0_i32_0, %arg1 : i32, i32, i32
  }
  func.func @transform_2(%arg0: i32, %arg1: i32) -> (i32, i32) {
    %c0_i32 = arith.constant 0 : i32
    %c0_i32_0 = arith.constant 0 : i32
    return %c0_i32, %arg1 : i32, i32
  }
  func.func @transform_3(%arg0: i32, %arg1: i32) -> (i32, i32) {
    %c0_i32 = arith.constant 0 : i32
    %c0_i32_0 = arith.constant 0 : i32
    return %c0_i32, %arg1 : i32, i32
  }
  func.func @transform_4(%arg0: i32, %arg1: i32) -> (i32, i32, i32) {
    %c0_i32 = arith.constant 0 : i32
    %c0_i32_0 = arith.constant 0 : i32
    return %arg0, %c0_i32, %arg1 : i32, i32, i32
  }
}

</mosaic_0001>

<bundles_post_ra>
// kernel: base_conv_forward.1
= control target key start
LH: loop header
LB: loop body
LE: loop exit
PB: predicated region body
PF: predicated region fallthrough
CT: control target
= control target key end

     0   :  { %s7407_s15 = smov 0   ;;  %s7409_s16 = smov 0   ;;  %s8782_s0 = inlined_call_operand.vmem [shape: bf16[2,440,4], index: 0, kind: input, shape index: {}]   ;;  %s8783_s1 = inlined_call_operand.vmem [shape: bf16[9,4,128], index: 1, kind: input, shape index: {}]   ;;  %s8784_s2 = inlined_call_operand.vmem [shape: f32[1,128], index: 2, kind: input, shape index: {}]   ;;  %s8785_s3 = inlined_call_operand.vmem [shape: f32[1,128], index: 3, kind: input, shape index: {}]   ;;  %s8786_s4 = inlined_call_operand.vmem [shape: f32[2,384,128], index: 4, kind: output, shape index: {}]  }
   0x1   :  { %s7411_s17 = smov 0  }
   0x2 LB: > { %s26_s18 = sadd.s32 1, %s7376_s16  ;;  %p5514_p0 = scmp.ge.s32.totalorder %s7380_s17, 1  ;;  %s7380_s17 = sphi %s7411_s17, %s14_s17   ;;  %s7376_s16 = sphi %s7409_s16, %s8788_s16   ;;  %s7372_s15 = sphi %s7407_s15, %s8787_s15  }
   0x3   : > { %p28_p1 = scmp.ge.s32.totalorder %s26_s18, 2  ;;  %p201_p2 = scmp.lt.s32.totalorder %s7380_s17, 3 }
   0x5   : > { %s8790_s18 = smov (%p28_p1, %s26_s18), 0  ;;  %p202_p3 = pnand %p5514_p0, %p201_p2 }
   0x6   : > { %v5517_v0 = vld [vmem:[%s8783_s1 + $0x2] sm:$0x3] (!%p202_p3)  ;;  %vm709_vm0 = vcmask (!%p202_p3), 1041408   ;;  %v5666_v1 = vld [vmem:[%s8783_s1 + $0x8] sm:$0x3] (!%p202_p3)  ;;  %p240_p4 = scmp.lt.s32.totalorder (!%p202_p3), %s7372_s15, 1 }
   0x7   : > { %205 = sbr.rel (%p202_p3) target bundleno = 712 (0x2c8), region = 36  ;;  %6980 = vmatprep.subr.msk.bf16.mxu1 (!%p202_p3), %vm709_vm0, %v5517_v0  ;;  %6984 = vmatprep.subr.msk.bf16.mxu0 (!%p202_p3), %vm709_vm0, %v5666_v1  ;;  %v711_v2 = vsel (!%p202_p3), %vm709_vm0, %v5517_v0, 0  ;;  %v7435_v3 = vsel (!%p202_p3), %vm709_vm0, %v5666_v1, 0  ;;  %v312_v4 = vld [vmem:[%s8783_s1] sm:$0x3] (!%p202_p3)  ;;  %vm636_vm2 = vcmask (!%p202_p3), 31744  }
   0x8   : > { %6145 = vmatpush3.bf16.msra.mxu1 (!%p202_p3), %v711_v2  ;;  %6345 = vmatpush3.bf16.msra.mxu0 (!%p202_p3), %v7435_v3  ;;  %v5716_v5 = vld [vmem:[%s8783_s1 + $0xa] sm:$0x3] (!%p202_p3)  ;;  %vm439_vm1 = vsmask.f32 (!%p202_p3), 7424  ;;  %v987_v6 = vsel (!%p202_p3), %vm709_vm0, %v312_v4, 0  ;;  %vm1220_vm3 = vcmask (!%p202_p3), 1046528  }
   0x9   : > { %6981 = vmatprep.subr.msk.bf16.mxu1 (!%p202_p3), %vm709_vm0, %v312_v4  ;;  %6986 = vmatprep.subr.msk.bf16.mxu0 (!%p202_p3), %vm709_vm0, %v5716_v5  ;;  %v2982_v12 = vsel (!%p202_p3), %vm709_vm0, %v5716_v5, 0  ;;  %v7490_v39 = vld [vmem:[%s8783_s1 + $0x4] sm:$0x3] (!%p202_p3)  ;;  %v7506_v53 = vld [vmem:[%s8783_s1 + $0xc] sm:$0x3] (!%p202_p3) }
   0xe   : > { %s8792_s15 = smov (!%p240_p4, %s7372_s15), 1 }
   0xf   : > { %s6990_s27 = smul.u32 220, %s8792_s15 }
  0x10   : > { %s6991_s25 = smul.u32 384, %s8792_s15 }
  0x11   : > { %s7452_s30 = scalar_lea.vmem %s8782_s0, %s6990_s27 }
  0x12   : > { %v264_v7 = vld [vmem:[%s7452_s30] sm:$0xf]  ;;  %v265_v8 = vld [vmem:[%s7452_s30 + $0x4] sm:$0xf]  ;;  %v7017_v10 = vld [vmem:[%s7452_s30 + $0x8] sm:$0xff]   ;;  %s8499_s27 = scalar_lea.vmem %s8786_s4, %s6991_s25 }
  0x13   : > { %v7457_v9 = vcombine.low %v264_v7, %v265_v8  ;;  %v2136_v11 = vld [vmem:[%s7452_s30 + $0xc] sm:$0xf]  ;;  %v7463_v13 = vld [vmem:[%s7452_s30 + $0x10] sm:$0xf]  ;;  %v448_v16 = vshll.u32 %v7017_v10, 16  ;;  %v452_v17 = vshrl.u32 %v7017_v10, 16 }
  0x14   : > { %v7468_v18 = vld [vmem:[%s7452_s30 + $0x14] sm:$0xff]   ;;  %v5667_v20 = vcombine.low %v2136_v11, %v7463_v13  ;;  %v7478_v28 = vld [vmem:[%s7452_s30 + $0x1c] sm:$0xff]   ;;  %v7483_v34 = vld [vmem:[%s7452_s30 + $0x24] sm:$0xff]  }
  0x15   : > { %v441_v14 = vshrl.u32 %v7457_v9, 16  ;;  %v443_v15 = vshll.u32 %v7457_v9, 16  ;;  %v7471_v19 = vld [vmem:[%s7452_s30 + $0x10] sm:$0xff]   ;;  %v450_v22 = vrot.slane %v448_v16, 1  ;;  %v2318_v23 = vshll.u32 %v7468_v18, 16  ;;  %v7022_v32 = vld [vmem:[%s7452_s30 + $0x18] sm:$0xff]  }
  0x16   : > { %v2322_v24 = vshrl.u32 %v7468_v18, 16  ;;  %v2311_v25 = vshrl.u32 %v5667_v20, 16  ;;  %v2313_v26 = vshll.u32 %v5667_v20, 16  ;;  %v456_v27 = vshll.u32 %v7471_v19, 16  ;;  %v7497_v48 = vld [vmem:[%s7452_s30 + $0x20] sm:$0xff]   ;;  %v7501_v52 = vld [vmem:[%s7452_s30 + $0x2c] sm:$0xff]  }
  0x17   : > { %v445_v21 = vrot.slane %v443_v15, 1  ;;  %v454_v30 = vor.u32 %v452_v17, %v450_v22  ;;  %v2320_v31 = vrot.slane %v2318_v23, 1  ;;  %v460_v33 = vshrl.u32 %v7471_v19, 16  ;;  %v7512_v58 = vld [vmem:[%s7452_s30 + $0x28] sm:$0xff]   ;;  %v7526_v4 = vld [vmem:[%s7452_s30 + $0x34] sm:$0xff]   ;;  %v7540_v20 = vld [vmem:[%s7452_s30 + $0x3c] sm:$0xff]  }
  0x18   : > { %v2315_v35 = vrot.slane %v2313_v26, 1  ;;  %v458_v36 = vrot.slane %v456_v27, 1  ;;  %v2326_v37 = vshll.u32 %v7478_v28, 16  ;;  %v2330_v38 = vshrl.u32 %v7478_v28, 16  ;;  %v7531_v8 = vld [vmem:[%s7452_s30 + $0x30] sm:$0xff]  }
  0x19   : > { %v446_v29 = vor.u32 %v445_v21, %v441_v14  ;;  %v2324_v41 = vor.u32 %v2322_v24, %v2320_v31  ;;  %v464_v42 = vshll.u32 %v7022_v32, 16  ;;  %v2334_v43 = vshll.u32 %v7483_v34, 16 }
  0x1a   : > { %v2316_v44 = vor.u32 %v2315_v35, %v2311_v25  ;;  %v459_v45 = vsel %vm439_vm1, %v454_v30, %v458_v36  ;;  %v2328_v46 = vrot.slane %v2326_v37, 1  ;;  %v462_v47 = vor.u32 %v460_v33, %v458_v36  ;;  %v7559_v36 = vld [vmem:[%s7452_s30 + $0x40] sm:$0xff]  }
  0x1b   : > { %v451_v40 = vsel %vm439_vm1, %v446_v29, %v450_v22  ;;  %v466_v49 = vrot.slane %v464_v42, 1  ;;  %v2336_v50 = vrot.slane %v2334_v43, 1  ;;  %v468_v51 = vshrl.u32 %v7022_v32, 16  ;;  %v7544_v22 = vld [vmem:[%s7452_s30 + $0x38] sm:$0xff]   ;;  %v7564_v42 = vld [vmem:[%s7452_s30 + $0x4c] sm:$0xff]  }
  0x1c   : > { %6146 = vmatprep.mubr.msk.bf16.mxu1 %vm636_vm2, %v451_v40  ;;  %v2321_v54 = vsel %vm439_vm1, %v2316_v44, %v2320_v31  ;;  %v2329_v55 = vsel %vm439_vm1, %v2324_v41, %v2328_v46  ;;  %v2332_v56 = vor.u32 %v2330_v38, %v2328_v46  ;;  %v472_v57 = vshll.u32 %v7497_v48, 16  ;;  %v7553_v31 = vld [vmem:[%s7452_s30 + $0x44] sm:$0xff]  }
  0x1d   : > { %6147 = vmatmul.mubr.msk.bf16.vlgmr.msra.gmra.mrb[0].mxu1 %vm636_vm2, %v459_v45  ;;  %6346 = vmatprep.mubr.msk.bf16.mxu0 %vm636_vm2, %v2321_v54  ;;  %v467_v59 = vsel %vm439_vm1, %v462_v47, %v466_v49  ;;  %v470_v60 = vor.u32 %v468_v51, %v466_v49  ;;  %v2338_v61 = vshrl.u32 %v7483_v34, 16  ;;  %v2342_v62 = vshll.u32 %v7501_v52, 16  ;;  %v7567_v43 = vld [vmem:[%s7452_s30 + $0x48] sm:$0xff]   ;;  %v7574_v51 = vld [vmem:[%s7452_s30 + $0x54] sm:$0xff]  }
  0x1e   : > { %6195 = vmatpush3.bf16.msra.mxu1 %v987_v6  ;;  %6347 = vmatmul.mubr.msk.bf16.vlgmr.msra.gmra.mrb[0].mxu0 %vm636_vm2, %v2329_v55  ;;  %v2337_v63 = vsel %vm439_vm1, %v2332_v56, %v2336_v50  ;;  %v474_v0 = vrot.slane %v472_v57, 1  ;;  %v476_v1 = vshrl.u32 %v7497_v48, 16  ;;  %v480_v2 = vshll.u32 %v7512_v58, 16 }
  0x1f   : > { %6982 = vmatprep.subr.msk.bf16.mxu1 %vm709_vm0, %v7490_v39  ;;  %6150 = vmatprep.mubr.msk.bf16.mxu1 %vm636_vm2, %v467_v59  ;;  %v2340_v5 = vor.u32 %v2338_v61, %v2336_v50  ;;  %v2344_v6 = vrot.slane %v2342_v62, 1  ;;  %v2346_v7 = vshrl.u32 %v7501_v52, 16  ;;  %v484_v10 = vshrl.u32 %v7512_v58, 16  ;;  %v7584_v62 = vld [vmem:[%s7452_s30 + $0x50] sm:$0xff]  }
  0x20   : > { %6395 = vmatpush3.bf16.msra.mxu0 %v2982_v12  ;;  %6350 = vmatprep.mubr.msk.bf16.mxu0 %vm636_vm2, %v2337_v63  ;;  %v475_v11 = vsel %vm439_vm1, %v470_v60, %v474_v0  ;;  %v478_v14 = vor.u32 %v476_v1, %v474_v0  ;;  %v482_v15 = vrot.slane %v480_v2, 1  ;;  %v2350_v16 = vshll.u32 %v7526_v4, 16 }
  0x21   : > { %6987 = vmatprep.subr.msk.bf16.mxu0 %vm709_vm0, %v7506_v53  ;;  %v2348_v12 = vor.u32 %v2346_v7, %v2344_v6  ;;  %v488_v17 = vshll.u32 %v7531_v8, 16  ;;  %v2354_v21 = vshrl.u32 %v7526_v4, 16  ;;  %v492_v25 = vshrl.u32 %v7531_v8, 16  ;;  %v7591_v7 = vld [vmem:[%s7452_s30 + $0x58] sm:$0xff]  }
  0x22   : > { %v483_v23 = vsel %vm439_vm1, %v478_v14, %v482_v15  ;;  %v2352_v24 = vrot.slane %v2350_v16, 1  ;;  %v2345_v26 = vsel %vm439_vm1, %v2340_v5, %v2344_v6  ;;  %v2358_v29 = vshll.u32 %v7540_v20, 16 }
  0x23   : > { %v490_v27 = vrot.slane %v488_v17, 1  ;;  %v496_v30 = vshll.u32 %v7544_v22, 16  ;;  %v486_v33 = vor.u32 %v484_v10, %v482_v15  ;;  %v2362_v35 = vshrl.u32 %v7540_v20, 16 }
  0x24   : > { %v2353_v32 = vsel %vm439_vm1, %v2348_v12, %v2352_v24  ;;  %v2360_v40 = vrot.slane %v2358_v29, 1  ;;  %v2366_v41 = vshll.u32 %v7553_v31, 16  ;;  %v2356_v44 = vor.u32 %v2354_v21, %v2352_v24 }
  0x25   : > { %6151 = vmatmul.mubr.msk.bf16.gmra.mrb[4].mxu1 %vm636_vm2, %v475_v11  ;;  %v494_v37 = vor.u32 %v492_v25, %v490_v27  ;;  %v498_v38 = vrot.slane %v496_v30, 1  ;;  %v504_v45 = vshll.u32 %v7559_v36, 16  ;;  %v491_v46 = vsel %vm439_vm1, %v486_v33, %v490_v27  ;;  %v7595_v11 = vld [vmem:[%s7452_s30 + $0x5c] sm:$0xff]  }
  0x26   : > { %6154 = vmatprep.mubr.msk.bf16.mxu1 %vm636_vm2, %v483_v23  ;;  %6351 = vmatmul.mubr.msk.bf16.gmra.mrb[4].mxu0 %vm636_vm2, %v2345_v26  ;;  %v2364_v47 = vor.u32 %v2362_v35, %v2360_v40  ;;  %v2368_v49 = vrot.slane %v2366_v41, 1  ;;  %v500_v50 = vshrl.u32 %v7544_v22, 16  ;;  %v508_v55 = vshrl.u32 %v7559_v36, 16  ;;  %v7602_v23 = vld [vmem:[%s7452_s30 + $0x64] sm:$0xff]  }
  0x27   : > { %6354 = vmatprep.mubr.msk.bf16.mxu0 %vm636_vm2, %v2353_v32  ;;  %v499_v54 = vsel %vm439_vm1, %v494_v37, %v498_v38  ;;  %v512_v56 = vshll.u32 %v7567_v43, 16  ;;  %v2374_v57 = vshll.u32 %v7564_v42, 16  ;;  %v2361_v59 = vsel %vm439_vm1, %v2356_v44, %v2360_v40  ;;  %v7612_v33 = vld [vmem:[%s7452_s30 + $0x60] sm:$0xff]  }
  0x28   : > { %v506_v60 = vrot.slane %v504_v45, 1  ;;  %v2370_v61 = vshrl.u32 %v7553_v31, 16  ;;  %v2369_v63 = vsel %vm439_vm1, %v2364_v47, %v2368_v49  ;;  %v502_v0 = vor.u32 %v500_v50, %v498_v38  ;;  %v7619_v45 = vld [vmem:[%s7452_s30 + $0x68] sm:$0xff]  }
  0x29   : > { %v2378_v1 = vshrl.u32 %v7564_v42, 16  ;;  %v2382_v2 = vshll.u32 %v7574_v51, 16  ;;  %v514_v6 = vrot.slane %v512_v56, 1  ;;  %v2376_v10 = vrot.slane %v2374_v57, 1  ;;  %v7625_v50 = vld [vmem:[%s7452_s30 + $0x6c] sm:$0xff]  }
  0x2a   : > { %v510_v5 = vor.u32 %v508_v55, %v506_v60  ;;  %v2372_v14 = vor.u32 %v2370_v61, %v2368_v49  ;;  %v520_v15 = vshll.u32 %v7584_v62, 16  ;;  %v507_v16 = vsel %vm439_vm1, %v502_v0, %v506_v60 }
  0x2b   : > { %v2380_v12 = vor.u32 %v2378_v1, %v2376_v10  ;;  %v2384_v17 = vrot.slane %v2382_v2, 1  ;;  %v516_v21 = vshrl.u32 %v7567_v43, 16  ;;  %v524_v25 = vshrl.u32 %v7584_v62, 16 }
  0x2c   : > { %v515_v24 = vsel %vm439_vm1, %v510_v5, %v514_v6  ;;  %v528_v26 = vshll.u32 %v7591_v7, 16  ;;  %v2390_v27 = vshll.u32 %v7595_v11, 16  ;;  %v2377_v29 = vsel %vm439_vm1, %v2372_v14, %v2376_v10 }
  0x2d   : > { %6155 = vmatmul.mubr.msk.bf16.gmra.mrb[8].mxu1 %vm636_vm2, %v491_v46  ;;  %v522_v30 = vrot.slane %v520_v15, 1  ;;  %v2386_v32 = vshrl.u32 %v7574_v51, 16  ;;  %v2385_v35 = vsel %vm439_vm1, %v2380_v12, %v2384_v17  ;;  %v518_v37 = vor.u32 %v516_v21, %v514_v6  ;;  %v7638_v6 = vld [vmem:[%s7452_s30 + $0x70] sm:$0xff]  }
  0x2e   : > { %6158 = vmatprep.mubr.msk.bf16.mxu1 %vm636_vm2, %v499_v54  ;;  %6355 = vmatmul.mubr.msk.bf16.gmra.mrb[8].mxu0 %vm636_vm2, %v2361_v59  ;;  %v2394_v38 = vshrl.u32 %v7595_v11, 16  ;;  %v2398_v40 = vshll.u32 %v7602_v23, 16  ;;  %v530_v44 = vrot.slane %v528_v26, 1  ;;  %v2392_v46 = vrot.slane %v2390_v27, 1 }
  0x2f   : > { %6358 = vmatprep.mubr.msk.bf16.mxu0 %vm636_vm2, %v2369_v63  ;;  %v526_v41 = vor.u32 %v524_v25, %v522_v30  ;;  %v2388_v47 = vor.u32 %v2386_v32, %v2384_v17  ;;  %v536_v49 = vshll.u32 %v7612_v33, 16  ;;  %v523_v54 = vsel %vm439_vm1, %v518_v37, %v522_v30  ;;  %v2854_v63 = vld [vmem:[%s7452_s30 + $0xc] sm:$0xe]  ;;  %v7644_v17 = vld [vmem:[%s7452_s30 + $0x78] sm:$0xff]  }
  0x30   : > { %v2396_v55 = vor.u32 %v2394_v38, %v2392_v46  ;;  %v2400_v56 = vrot.slane %v2398_v40, 1  ;;  %v532_v57 = vshrl.u32 %v7591_v7, 16  ;;  %v540_v60 = vshrl.u32 %v7612_v33, 16  ;;  %v7661_v40 = vld [vmem:[%s7452_s30 + $0x80] sm:$0xff]  }
  0x31   : > { %v531_v59 = vsel %vm439_vm1, %v526_v41, %v530_v44  ;;  %v544_v61 = vshll.u32 %v7619_v45, 16  ;;  %v2393_v0 = vsel %vm439_vm1, %v2388_v47, %v2392_v46  ;;  %v538_v1 = vrot.slane %v536_v49, 1  ;;  %v7666_v47 = vld [vmem:[%s7452_s30 + $0x88] sm:$0xff]  }
  0x32   : > { %v2402_v2 = vshrl.u32 %v7602_v23, 16  ;;  %v2406_v5 = vshll.u32 %v7625_v50, 16  ;;  %v2401_v10 = vsel %vm439_vm1, %v2396_v55, %v2400_v56  ;;  %v534_v14 = vor.u32 %v532_v57, %v530_v44 }
  0x33   : > { %v5717_v15 = vcombine.low %v2854_v63, %v7463_v13  ;;  %v546_v12 = vrot.slane %v544_v61, 1  ;;  %v552_v25 = vshll.u32 %v7638_v6, 16  ;;  %v2861_v13 = vrot.slane %v7468_v18, 1  ;;  %v7679_v63 = vld [vmem:[%s7452_s30 + $0x90] sm:$0xff]  }
  0x34   : > { %v2404_v21 = vor.u32 %v2402_v2, %v2400_v56  ;;  %v539_v26 = vsel %vm439_vm1, %v534_v14, %v538_v1  ;;  %v556_v32 = vshrl.u32 %v7638_v6, 16  ;;  %v2863_v49 = vrot.slane %v7478_v28, 1 }
  0x35   : > { %6159 = vmatmul.mubr.msk.bf16.gmra.mrb[12].mxu1 %vm636_vm2, %v507_v16  ;;  %v542_v16 = vor.u32 %v540_v60, %v538_v1  ;;  %v2860_v27 = vrot.slane %v5717_v15, 1  ;;  %v554_v38 = vrot.slane %v552_v25, 1  ;;  %v568_v55 = vshll.u32 %v7661_v40, 16  ;;  %v7689_v15 = vld [vmem:[%s7452_s30 + $0x98] sm:$0xff]  }
  0x36   : > { %6162 = vmatprep.mubr.msk.bf16.mxu1 %vm636_vm2, %v515_v24  ;;  %6359 = vmatmul.mubr.msk.bf16.gmra.mrb[12].mxu0 %vm636_vm2, %v2377_v29  ;;  %v7648_v24 = vrot.slane %v2406_v5, 1  ;;  %v548_v29 = vshrl.u32 %v7619_v45, 16  ;;  %v564_v57 = vshrl.u32 %v7644_v17, 16  ;;  %v576_v61 = vshll.u32 %v7666_v47, 16 }
  0x37   : > { %6362 = vmatprep.mubr.msk.bf16.mxu0 %vm636_vm2, %v2385_v35  ;;  %v547_v30 = vsel %vm439_vm1, %v542_v16, %v546_v12  ;;  %v560_v35 = vshll.u32 %v7644_v17, 16  ;;  %v2862_v18 = vsel %vm1220_vm3, %v2860_v27, %v2861_v13  ;;  %v558_v44 = vor.u32 %v556_v32, %v554_v38 }
  0x38   : > { %v2409_v37 = vsel %vm439_vm1, %v2404_v21, %v7648_v24  ;;  %v550_v41 = vor.u32 %v548_v29, %v546_v12  ;;  %v2864_v28 = vsel %vm1220_vm3, %v2861_v13, %v2863_v49  ;;  %v584_v14 = vshll.u32 %v7679_v63, 16  ;;  %v7703_v13 = vld [vmem:[%s8783_s1 + $0xe] sm:$0x3] }
  0x39   : > { %v562_v46 = vrot.slane %v560_v35, 1  ;;  %v2869_v12 = vrot.slane %v7526_v4, 1  ;;  %v580_v21 = vshrl.u32 %v7666_v47, 16  ;;  %v592_v27 = vshll.u32 %v7689_v15, 16 }
  0x3a   : > { %v555_v56 = vsel %vm439_vm1, %v550_v41, %v554_v38  ;;  %v586_v29 = vrot.slane %v584_v14, 1  ;;  %v7715_v38 = vld [vmem:[%s7452_s30 + $0xa8] sm:$0xff]  }
  0x3b   : > { %v563_v60 = vsel %vm439_vm1, %v558_v44, %v562_v46  ;;  %v566_v2 = vor.u32 %v564_v57, %v562_v46  ;;  %v2873_v46 = vrot.slane %v7553_v31, 1  ;;  %v7728_v57 = vld [vmem:[%s7452_s30 + $0xb0] sm:$0xff]   ;;  %v612_v14 = vshrl.u32 %v7715_v38, 16 }
  0x3d   : > { %6163 = vmatmul.mubr.msk.bf16.gmra.mrb[16].mxu1 %vm636_vm2, %v523_v54  ;;  %v2865_v54 = vrot.slane %v7483_v34, 1  ;;  %v3500_v34 = vsel %vm709_vm0, %v7506_v53, 0  ;;  %v2867_v53 = vrot.slane %v7501_v52, 1  ;;  %v7706_v52 = vld [vmem:[%s7452_s30 + $0xa0] sm:$0xff]  }
  0x3e   : > { %6166 = vmatprep.mubr.msk.bf16.mxu1 %vm636_vm2, %v531_v59  ;;  %6363 = vmatmul.mubr.msk.bf16.gmra.mrb[16].mxu0 %vm636_vm2, %v2393_v0  ;;  %v572_v59 = vshrl.u32 %v7661_v40, 16  ;;  %v570_v0 = vrot.slane %v568_v55, 1  ;;  %v600_v41 = vshll.u32 %v7706_v52, 16  ;;  %v604_v55 = vshrl.u32 %v7706_v52, 16 }
  0x3f   : > { %6366 = vmatprep.mubr.msk.bf16.mxu0 %vm636_vm2, %v2401_v10  ;;  %v2866_v1 = vsel %vm1220_vm3, %v2863_v49, %v2865_v54  ;;  %v578_v10 = vrot.slane %v576_v61, 1  ;;  %v2868_v4 = vsel %vm1220_vm3, %v2865_v54, %v2867_v53  ;;  %v596_v49 = vshrl.u32 %v7689_v15, 16 }
  0x40   : > { %v574_v5 = vor.u32 %v572_v59, %v570_v0  ;;  %v571_v16 = vsel %vm439_vm1, %v566_v2, %v570_v0  ;;  %v602_v59 = vrot.slane %v600_v41, 1  ;;  %v2875_v0 = vrot.slane %v7564_v42, 1 }
  0x41   : > { %v582_v32 = vor.u32 %v580_v21, %v578_v10  ;;  %v616_v2 = vshll.u32 %v7728_v57, 16 }
  0x42   : > { %v579_v25 = vsel %vm439_vm1, %v574_v5, %v578_v10  ;;  %v2876_v42 = vsel %vm1220_vm3, %v2873_v46, %v2875_v0 }
  0x43   : > { %v587_v44 = vsel %vm439_vm1, %v582_v32, %v586_v29  ;;  %v618_v21 = vrot.slane %v616_v2, 1 }
  0x45   : > { %6167 = vmatmul.mubr.msk.bf16.gmra.mrb[20].mxu1 %vm636_vm2, %v539_v26  ;;  %v588_v26 = vshrl.u32 %v7679_v63, 16 }
  0x46   : > { %6170 = vmatprep.mubr.msk.bf16.mxu1 %vm636_vm2, %v547_v30  ;;  %6367 = vmatmul.mubr.msk.bf16.gmra.mrb[20].mxu0 %vm636_vm2, %v2409_v37  ;;  %v2870_v30 = vsel %vm1220_vm3, %v2867_v53, %v2869_v12  ;;  %v594_v37 = vrot.slane %v592_v27, 1  ;;  %v620_v53 = vshrl.u32 %v7728_v57, 16 }
  0x47   : > { %6396 = vmatprep.mubr.msk.bf16.mxu0 %vm636_vm2, %v2862_v18  ;;  %v590_v35 = vor.u32 %v588_v26, %v586_v29  ;;  %v2871_v18 = vrot.slane %v7540_v20, 1  ;;  %v2879_v29 = vrot.slane %v7595_v11, 1  ;;  %v7055_v11 = vld [vmem:[%s7452_s30 + $0x74] sm:$0xff]  }
  0x48   : > { %v598_v61 = vor.u32 %v596_v49, %v594_v37  ;;  %v622_v27 = vor.u32 %v620_v53, %v618_v21  ;;  %v2885_v49 = vrot.slane %v7055_v11, 1  ;;  %v7812_v53 = vld [vmem:[%s7452_s30 + $0xa4] sm:$0xff]  }
  0x49   : > { %v595_v54 = vsel %vm439_vm1, %v590_v35, %v594_v37  ;;  %v2872_v20 = vsel %vm1220_vm3, %v2869_v12, %v2871_v18  ;;  %v2874_v31 = vsel %vm1220_vm3, %v2871_v18, %v2873_v46  ;;  %v7748_v12 = vld [vmem:[%s7452_s30 + $0xc0] ss:$0 sps:$4 sm:$0x11]   ;;  %v2883_v46 = vrot.slane %v7625_v50, 1  ;;  %v7069_v11 = vld [vmem:[%s7452_s30 + $0x28] sm:$0xff]  }
  0x4a   : > { %v603_v10 = vsel %vm439_vm1, %v598_v61, %v602_v59  ;;  %v632_v32 = vshll.u32 %v7748_v12, 16  ;;  %v1343_v50 = vsel %vm709_vm0, %v7490_v39, 0 }
  0x4c   : > { %v634_v41 = vrot.slane %v632_v32, 1 }
  0x4d   : > { %6171 = vmatmul.mubr.msk.bf16.gmra.mrb[24].mxu1 %vm636_vm2, %v555_v56  ;;  %v608_v56 = vshll.u32 %v7715_v38, 16 }
  0x4e   : > { %6174 = vmatprep.mubr.msk.bf16.mxu1 %vm636_vm2, %v563_v60  ;;  %6397 = vmatmul.mubr.msk.bf16.vlgmr.msra.gmra.mrb[0].mxu0 %vm636_vm2, %v2864_v28  ;;  %v7733_v60 = vld [vmem:[%s7452_s30 + $0xb8] sm:$0xff]   ;;  %v606_v28 = vor.u32 %v604_v55, %v602_v59  ;;  %v2886_v59 = vsel %vm1220_vm3, %v2883_v46, %v2885_v49 }
  0x4f   : > { %6445 = vmatpush3.bf16.msra.mxu0 %v3500_v34  ;;  %6400 = vmatprep.mubr.msk.bf16.mxu0 %vm636_vm2, %v2866_v1  ;;  %v610_v34 = vrot.slane %v608_v56, 1  ;;  %v2877_v1 = vrot.slane %v7574_v51, 1  ;;  %v624_v5 = vshll.u32 %v7733_v60, 16  ;;  %v7056_v55 = vld [vmem:[%s7452_s30 + $0x7c] sm:$0xff]  }
  0x50   : > { %6988 = vmatprep.subr.msk.bf16.mxu0 %vm709_vm0, %v7703_v13 }
  0x51   : > { %v626_v51 = vrot.slane %v624_v5, 1  ;;  %v614_v26 = vor.u32 %v612_v14, %v610_v34  ;;  %v2880_v18 = vsel %vm1220_vm3, %v2877_v1, %v2879_v29  ;;  %v7809_v14 = vld [vmem:[%s7452_s30 + $0x9c] sm:$0xff]  }
  0x53   : > { %v619_v35 = vsel %vm439_vm1, %v614_v26, %v618_v21  ;;  %v627_v37 = vsel %vm439_vm1, %v622_v27, %v626_v51  ;;  %v2897_v21 = vrot.slane %v7812_v53, 1 }
  0x55   : > { %6175 = vmatmul.mubr.msk.bf16.gmra.mrb[28].mxu1 %vm636_vm2, %v571_v16  ;;  %v611_v16 = vsel %vm439_vm1, %v606_v28, %v610_v34  ;;  %v7785_v28 = vld [vmem:[%s8783_s1 + $0x6] sm:$0x3]  ;;  %v7058_v34 = vld [vmem:[%s7452_s30 + $0x8c] sm:$0xff]  }
  0x56   : > { %6178 = vmatprep.mubr.msk.bf16.mxu1 %vm636_vm2, %v579_v25  ;;  %6401 = vmatmul.mubr.msk.bf16.gmra.mrb[4].mxu0 %vm636_vm2, %v2868_v4  ;;  %v2878_v25 = vsel %vm1220_vm3, %v2875_v0, %v2877_v1  ;;  %v2881_v4 = vrot.slane %v7602_v23, 1  ;;  %v7059_v0 = vld [vmem:[%s7452_s30 + $0x94] sm:$0xff]   ;;  %v2891_v2 = vrot.slane %v7058_v34, 1 }
  0x57   : > { %6404 = vmatprep.mubr.msk.bf16.mxu0 %vm636_vm2, %v2870_v30  ;;  %v628_v30 = vshrl.u32 %v7733_v60, 16  ;;  %v2893_v5 = vrot.slane %v7059_v0, 1  ;;  %v7080_v0 = vld [vmem:[%s7452_s30 + $0x78] sm:$0xff]  }
  0x58   : > { %v2882_v23 = vsel %vm1220_vm3, %v2879_v29, %v2881_v4  ;;  %v2884_v56 = vsel %vm1220_vm3, %v2881_v4, %v2883_v46  ;;  %v7841_v4 = vld [vmem:[%s7452_s30 + $0xbc] sm:$0xff]   ;;  %v7073_v46 = vld [vmem:[%s7452_s30 + $0x48] sm:$0xff]  }
  0x59   : > { %v2903_v32 = vrot.slane %v7841_v4, 1 }
  0x5d   : > { %6179 = vmatmul.mubr.msk.bf16.gmra.mrb[32].mxu1 %vm636_vm2, %v587_v44  ;;  %v630_v44 = vor.u32 %v628_v30, %v626_v51  ;;  %v7822_v51 = vld [vmem:[%s7452_s30 + $0xac] sm:$0xff]   ;;  %v7847_v30 = vld [vmem:[%s7452_s30 + $0xc4] sm:$0xff]  }
  0x5e   : > { %6182 = vmatprep.mubr.msk.bf16.mxu1 %vm636_vm2, %v595_v54  ;;  %6405 = vmatmul.mubr.msk.bf16.gmra.mrb[8].mxu0 %vm636_vm2, %v2872_v20  ;;  %v7057_v20 = vld [vmem:[%s7452_s30 + $0x84] sm:$0xff]   ;;  %v2899_v27 = vrot.slane %v7822_v51, 1 }
  0x5f   : > { %6408 = vmatprep.mubr.msk.bf16.mxu0 %vm636_vm2, %v2874_v31  ;;  %v635_v54 = vsel %vm439_vm1, %v630_v44, %v634_v41  ;;  %v2887_v31 = vrot.slane %v7056_v55, 1  ;;  %v2889_v61 = vrot.slane %v7057_v20, 1  ;;  %v7067_v41 = vld [vmem:[%s7452_s30 + $0x18] sm:$0xff]   ;;  %v7072_v44 = vld [vmem:[%s7452_s30 + $0x40] sm:$0xff]  }
  0x60   : > { %v1214_v55 = vld [vmem:[%s7452_s30] sm:$0xe] }
  0x61   : > { %v2888_v39 = vsel %vm1220_vm3, %v2885_v49, %v2887_v31  ;;  %v2890_v1 = vsel %vm1220_vm3, %v2887_v31, %v2889_v61  ;;  %v7074_v49 = vld [vmem:[%s7452_s30 + $0x50] sm:$0xff]  }
  0x65   : > { %6183 = vmatmul.mubr.msk.bf16.gmra.mrb[36].mxu1 %vm636_vm2, %v603_v10  ;;  %v7803_v10 = vld [vmem:[%s7452_s30 + $0x18] sm:$0xff]  }
  0x66   : > { %6186 = vmatprep.mubr.msk.bf16.mxu1 %vm636_vm2, %v611_v16  ;;  %6409 = vmatmul.mubr.msk.bf16.gmra.mrb[12].mxu0 %vm636_vm2, %v2876_v42  ;;  %v2894_v16 = vsel %vm1220_vm3, %v2891_v2, %v2893_v5  ;;  %v2895_v42 = vrot.slane %v7809_v14, 1 }
  0x67   : > { %6412 = vmatprep.mubr.msk.bf16.mxu0 %vm636_vm2, %v2878_v25 }
  0x68   : > { %v2896_v25 = vsel %vm1220_vm3, %v2893_v5, %v2895_v42  ;;  %v2898_v26 = vsel %vm1220_vm3, %v2895_v42, %v2897_v21  ;;  %v7081_v42 = vld [vmem:[%s7452_s30 + $0x80] sm:$0xff]  }
  0x6d   : > { %6187 = vmatmul.mubr.msk.bf16.gmra.mrb[40].mxu1 %vm636_vm2, %v619_v35  ;;  %v7857_v35 = vld [vmem:[%s7452_s30 + $0xcc] ss:$0 sps:$4 sm:$0x11]  }
  0x6e   : > { %6190 = vmatprep.mubr.msk.bf16.mxu1 %vm636_vm2, %v627_v37  ;;  %6413 = vmatmul.mubr.msk.bf16.gmra.mrb[16].mxu0 %vm636_vm2, %v2880_v18  ;;  %v2907_v18 = vrot.slane %v7857_v35, 1 }
  0x6f   : > { %6416 = vmatprep.mubr.msk.bf16.mxu0 %vm636_vm2, %v2882_v23  ;;  %v7070_v23 = vld [vmem:[%s7452_s30 + $0x30] sm:$0xff]  }
  0x75   : > { %6191 = vmatmul.mubr.msk.bf16.gmra.mrb[44].mxu1 %vm636_vm2, %v635_v54  ;;  %v7075_v54 = vld [vmem:[%s7452_s30 + $0x58] sm:$0xff]  }
  0x76   : > { %6196 = vmatprep.mubr.msk.bf16.mxu1 %vm636_vm2, %v7457_v9  ;;  %6417 = vmatmul.mubr.msk.bf16.gmra.mrb[20].mxu0 %vm636_vm2, %v2884_v56  ;;  %v7789_v9 = vld [vmem:[%s7452_s30 + $0x8] sm:$0xff]   ;;  %v7336_v56 = vld [vmem:[%s7452_s30 + $0x4] sm:$0xf] }
  0x77   : > { %6420 = vmatprep.mubr.msk.bf16.mxu0 %vm636_vm2, %v2886_v59  ;;  %v5592_v20 = vcombine.low %v1214_v55, %v7336_v56  ;;  %v7076_v59 = vld [vmem:[%s7452_s30 + $0x60] sm:$0xff]   ;;  %v7975_v55 = vld [vmem:[%s7452_s30 + $0x1c] sm:$0xf]  ;;  %v7087_v56 = vld [vmem:[%s7452_s30 + $0xb0] sm:$0xff]  }
  0x79   : > { %v1221_v31 = vrot.slane %v5592_v20, 1  ;;  %v7088_v20 = vld [vmem:[%s7452_s30 + $0xb8] sm:$0xff]  }
  0x7d   : > { %6197 = vmatmul.mubr.msk.bf16.vlgmr.msra.gmra.mrb[0].mxu1 %vm636_vm2, %v7789_v9 }
  0x7e   : > { %6245 = vmatpush3.bf16.msra.mxu1 %v1343_v50  ;;  %6200 = vmatprep.mubr.msk.bf16.mxu1 %vm636_vm2, %v7471_v19  ;;  %v2892_v19 = vsel %vm1220_vm3, %v2889_v61, %v2891_v2  ;;  %v7077_v50 = vld [vmem:[%s7452_s30 + $0x68] sm:$0xff]   ;;  %v1222_v61 = vrot.slane %v7789_v9, 1  ;;  %v1226_v9 = vrot.slane %v7803_v10, 1 }
  0x7f   : > { %6983 = vmatprep.subr.msk.bf16.mxu1 %vm709_vm0, %v7785_v28  ;;  %6421 = vmatmul.mubr.msk.bf16.gmra.mrb[24].mxu0 %vm636_vm2, %v2888_v39  ;;  %v7078_v39 = vld [vmem:[%s7452_s30 + $0x70] sm:$0xff]  }
  0x80   : > { %6424 = vmatprep.mubr.msk.bf16.mxu0 %vm636_vm2, %v2890_v1  ;;  %v1223_v34 = vsel %vm1220_vm3, %v1221_v31, %v1222_v61  ;;  %v7337_v1 = vld [vmem:[%s7452_s30 + $0x10] sm:$0xff]  }
  0x81   : > { %v1224_v2 = vrot.slane %v7337_v1, 1 }
  0x83   : > { %v1225_v5 = vsel %vm1220_vm3, %v1222_v61, %v1224_v2  ;;  %v7346_v61 = vld [vmem:[%s7452_s30 + $0x58] sm:$0xff]  }
  0x85   : > { %6201 = vmatmul.mubr.msk.bf16.gmra.mrb[4].mxu1 %vm636_vm2, %v7803_v10  ;;  %v7338_v10 = vld [vmem:[%s7452_s30 + $0x20] sm:$0xff]  }
  0x86   : > { %6204 = vmatprep.mubr.msk.bf16.mxu1 %vm636_vm2, %v7497_v48  ;;  %v7828_v48 = vld [vmem:[%s7452_s30 + $0xb4] sm:$0xff]  }
  0x87   : > { %6425 = vmatmul.mubr.msk.bf16.gmra.mrb[28].mxu0 %vm636_vm2, %v2892_v19  ;;  %v2901_v29 = vrot.slane %v7828_v48, 1  ;;  %v1861_v19 = vsel %vm709_vm0, %v7785_v28, 0  ;;  %v7340_v28 = vld [vmem:[%s8783_s1 + $0x8] sm:$0x3] }
  0x88   : > { %6428 = vmatprep.mubr.msk.bf16.mxu0 %vm636_vm2, %v2894_v16  ;;  %v1227_v16 = vsel %vm1220_vm3, %v1224_v2, %v1226_v9 }
  0x8d   : > { %6205 = vmatmul.mubr.msk.bf16.gmra.mrb[8].mxu1 %vm636_vm2, %v7512_v58  ;;  %v2900_v58 = vsel %vm1220_vm3, %v2897_v21, %v2899_v27  ;;  %v7082_v21 = vld [vmem:[%s7452_s30 + $0x88] sm:$0xff]  }
  0x8e   : > { %6208 = vmatprep.mubr.msk.bf16.mxu1 %vm636_vm2, %v7531_v8  ;;  %v2902_v8 = vsel %vm1220_vm3, %v2899_v27, %v2901_v29 }
  0x8f   : > { %6429 = vmatmul.mubr.msk.bf16.gmra.mrb[32].mxu0 %vm636_vm2, %v2896_v25  ;;  %v1228_v25 = vrot.slane %v7338_v10, 1 }
  0x90   : > { %6432 = vmatprep.mubr.msk.bf16.mxu0 %vm636_vm2, %v2898_v26  ;;  %v7339_v26 = vld [vmem:[%s7452_s30 + $0x28] sm:$0xff]  }
  0x91   : > { %v1230_v27 = vrot.slane %v7339_v26, 1  ;;  %v8000_v26 = vld [vmem:[%s7452_s30 + $0x28] sm:$0xff]  }
  0x95   : > { %6209 = vmatmul.mubr.msk.bf16.gmra.mrb[12].mxu1 %vm636_vm2, %v7544_v22  ;;  %v2905_v22 = vrot.slane %v7847_v30, 1 }
  0x96   : > { %6212 = vmatprep.mubr.msk.bf16.mxu1 %vm636_vm2, %v7559_v36  ;;  %v2904_v36 = vsel %vm1220_vm3, %v2901_v29, %v2903_v32  ;;  %v1229_v29 = vsel %vm1220_vm3, %v1226_v9, %v1228_v25  ;;  %v7089_v9 = vld [vmem:[%s7452_s30 + $0xc0] sm:$0xff]  }
  0x97   : > { %6433 = vmatmul.mubr.msk.bf16.gmra.mrb[36].mxu0 %vm636_vm2, %v2900_v58  ;;  %v2906_v37 = vsel %vm1220_vm3, %v2903_v32, %v2905_v22  ;;  %v1231_v58 = vsel %vm1220_vm3, %v1228_v25, %v1230_v27  ;;  %v7084_v32 = vld [vmem:[%s7452_s30 + $0x98] sm:$0xff]   ;;  %v1246_v25 = vrot.slane %v7619_v45, 1 }
  0x98   : > { %6436 = vmatprep.mubr.msk.bf16.mxu0 %vm636_vm2, %v2902_v8  ;;  %v7083_v8 = vld [vmem:[%s7452_s30 + $0x90] sm:$0xff]  }
  0x9d   : > { %6213 = vmatmul.mubr.msk.bf16.gmra.mrb[16].mxu1 %vm636_vm2, %v7567_v43  ;;  %v2908_v43 = vsel %vm1220_vm3, %v2905_v22, %v2907_v18  ;;  %v7341_v22 = vld [vmem:[%s7452_s30 + $0x30] sm:$0xff]  }
  0x9e   : > { %6216 = vmatprep.mubr.msk.bf16.mxu1 %vm636_vm2, %v7584_v62  ;;  %v7068_v62 = vld [vmem:[%s7452_s30 + $0x20] sm:$0xff]  }
  0x9f   : > { %6437 = vmatmul.mubr.msk.bf16.gmra.mrb[40].mxu0 %vm636_vm2, %v2904_v36  ;;  %v1232_v36 = vrot.slane %v7341_v22, 1  ;;  %v3965_v22 = vshll.u32 %v8000_v26, 16 }
  0xa0   : > { %6440 = vmatprep.mubr.msk.bf16.mxu0 %vm636_vm2, %v2906_v37  ;;  %v7342_v37 = vld [vmem:[%s7452_s30 + $0x38] sm:$0xff]  }
  0xa1   : > { %v1234_v18 = vrot.slane %v7342_v37, 1  ;;  %v1248_v37 = vrot.slane %v7638_v6, 1 }
  0xa5   : > { %6217 = vmatmul.mubr.msk.bf16.gmra.mrb[20].mxu1 %vm636_vm2, %v7591_v7  ;;  %v4218_v7 = vsel %vm709_vm0, %v7703_v13, 0  ;;  %v7071_v13 = vld [vmem:[%s7452_s30 + $0x38] sm:$0xff]  }
  0xa6   : > { %6220 = vmatprep.mubr.msk.bf16.mxu1 %vm636_vm2, %v7612_v33  ;;  %v7884_v33 = vld [vmem:[%s8783_s1 + $0x10] sm:$0x3] }
  0xa7   : > { %6441 = vmatmul.mubr.msk.bf16.gmra.mrb[44].mxu0 %vm636_vm2, %v2908_v43  ;;  %v1233_v43 = vsel %vm1220_vm3, %v1230_v27, %v1232_v36 }
  0xa8   : > { %6446 = vmatprep.mubr.msk.bf16.mxu0 %vm636_vm2, %v7067_v41  ;;  %v1235_v41 = vsel %vm1220_vm3, %v1232_v36, %v1234_v18 }
  0xad   : > { %6221 = vmatmul.mubr.msk.bf16.gmra.mrb[24].mxu1 %vm636_vm2, %v7619_v45 }
  0xae   : > { %6224 = vmatprep.mubr.msk.bf16.mxu1 %vm636_vm2, %v7638_v6  ;;  %v8025_v6 = vld [vmem:[%s7452_s30 + $0x40] sm:$0xff]  }
  0xaf   : > { %6447 = vmatmul.mubr.msk.bf16.vlgmr.msra.gmra.mrb[0].mxu0 %vm636_vm2, %v7068_v62  ;;  %v7085_v62 = vld [vmem:[%s7452_s30 + $0xa0] sm:$0xff]  }
  0xb0   : > { %6495 = vmatpush3.bf16.msra.mxu0 %v4218_v7  ;;  %6450 = vmatprep.mubr.msk.bf16.mxu0 %vm636_vm2, %v7069_v11  ;;  %v7086_v11 = vld [vmem:[%s7452_s30 + $0xa8] sm:$0xff]   ;;  %v7343_v7 = vld [vmem:[%s7452_s30 + $0x40] sm:$0xff]  }
  0xb1   : > { %6989 = vmatprep.subr.msk.bf16.mxu0 %vm709_vm0, %v7884_v33 }
  0xb5   : > { %6225 = vmatmul.mubr.msk.bf16.gmra.mrb[28].mxu1 %vm636_vm2, %v7644_v17 }
  0xb6   : > { %6228 = vmatprep.mubr.msk.bf16.mxu1 %vm636_vm2, %v7661_v40 }
  0xb7   : > { %6451 = vmatmul.mubr.msk.bf16.gmra.mrb[4].mxu0 %vm636_vm2, %v7070_v23  ;;  %v1236_v23 = vrot.slane %v7343_v7, 1 }
  0xb8   : > { %6454 = vmatprep.mubr.msk.bf16.mxu0 %vm636_vm2, %v7071_v13  ;;  %v7344_v13 = vld [vmem:[%s7452_s30 + $0x48] sm:$0xff]  }
  0xbd   : > { %6229 = vmatmul.mubr.msk.bf16.gmra.mrb[32].mxu1 %vm636_vm2, %v7666_v47 }
  0xbe   : > { %6232 = vmatprep.mubr.msk.bf16.mxu1 %vm636_vm2, %v7679_v63 }
  0xbf   : > { %6455 = vmatmul.mubr.msk.bf16.gmra.mrb[8].mxu0 %vm636_vm2, %v7072_v44  ;;  %v1238_v44 = vrot.slane %v7344_v13, 1 }
  0xc0   : > { %6458 = vmatprep.mubr.msk.bf16.mxu0 %vm636_vm2, %v7073_v46  ;;  %v1237_v46 = vsel %vm1220_vm3, %v1234_v18, %v1236_v23  ;;  %v3969_v18 = vshrl.u32 %v8000_v26, 16 }
  0xc5   : > { %6233 = vmatmul.mubr.msk.bf16.gmra.mrb[36].mxu1 %vm636_vm2, %v7689_v15 }
  0xc6   : > { %6236 = vmatprep.mubr.msk.bf16.mxu1 %vm636_vm2, %v7706_v52 }
  0xc7   : > { %6459 = vmatmul.mubr.msk.bf16.gmra.mrb[12].mxu0 %vm636_vm2, %v7074_v49  ;;  %v1239_v49 = vsel %vm1220_vm3, %v1236_v23, %v1238_v44  ;;  %v1249_v23 = vsel %vm1220_vm3, %v1246_v25, %v1248_v37 }
  0xc8   : > { %6462 = vmatprep.mubr.msk.bf16.mxu0 %vm636_vm2, %v7075_v54  ;;  %v3775_v54 = vld [vmem:[%s7452_s30 + $0x18] sm:$0xf] }
  0xc9   : > { %v5792_v31 = vcombine.low %v3775_v54, %v7975_v55  ;;  %v4621_v54 = vsel %vm709_vm0, %v7884_v33, 0 }
  0xcb   : > { %v3952_v1 = vshll.u32 %v5792_v31, 16 }
  0xcd   : > { %6237 = vmatmul.mubr.msk.bf16.gmra.mrb[40].mxu1 %vm636_vm2, %v7715_v38 }
  0xce   : > { %6240 = vmatprep.mubr.msk.bf16.mxu1 %vm636_vm2, %v7728_v57 }
  0xcf   : > { %6463 = vmatmul.mubr.msk.bf16.gmra.mrb[16].mxu0 %vm636_vm2, %v7076_v59  ;;  %v7345_v59 = vld [vmem:[%s7452_s30 + $0x50] sm:$0xff]  }
  0xd0   : > { %6466 = vmatprep.mubr.msk.bf16.mxu0 %vm636_vm2, %v7077_v50  ;;  %v1240_v50 = vrot.slane %v7345_v59, 1  ;;  %v1252_v59 = vrot.slane %v7661_v40, 1 }
  0xd5   : > { %6241 = vmatmul.mubr.msk.bf16.gmra.mrb[44].mxu1 %vm636_vm2, %v7733_v60 }
  0xd6   : > { %6246 = vmatprep.mubr.msk.bf16.mxu1 %vm636_vm2, %v1223_v34  ;;  %v1242_v34 = vrot.slane %v7346_v61, 1  ;;  %v1254_v61 = vrot.slane %v7666_v47, 1 }
  0xd7   : > { %6467 = vmatmul.mubr.msk.bf16.gmra.mrb[20].mxu0 %vm636_vm2, %v7078_v39  ;;  %v1241_v39 = vsel %vm1220_vm3, %v1238_v44, %v1240_v50 }
  0xd8   : > { %6470 = vmatprep.mubr.msk.bf16.mxu0 %vm636_vm2, %v7080_v0  ;;  %v7988_v0 = vld [vmem:[%s7452_s30 + $0x20] sm:$0xff]   ;;  %v1243_v2 = vsel %vm1220_vm3, %v1240_v50, %v1242_v34 }
  0xd9   : > { %v3957_v10 = vshll.u32 %v7988_v0, 16  ;;  %v3961_v45 = vshrl.u32 %v7988_v0, 16 }
  0xdd   : > { %6247 = vmatmul.mubr.msk.bf16.vlgmr.msra.gmra.mrb[0].mxu1 %vm636_vm2, %v1225_v5  ;;  %v7090_v5 = vld [vmem:[%s7452_s30 + $0xc8] sm:$0xff]  }
  0xde   : > { %6295 = vmatpush3.bf16.msra.mxu1 %v1861_v19  ;;  %6250 = vmatprep.mubr.msk.bf16.mxu1 %vm636_vm2, %v1227_v16  ;;  %v7347_v19 = vld [vmem:[%s7452_s30 + $0x60] sm:$0xff]  }
  0xdf   : > { %6985 = vmatprep.subr.msk.bf16.mxu1 %vm709_vm0, %v7340_v28  ;;  %6471 = vmatmul.mubr.msk.bf16.gmra.mrb[24].mxu0 %vm636_vm2, %v7081_v42  ;;  %v1244_v16 = vrot.slane %v7347_v19, 1  ;;  %v3950_v42 = vshrl.u32 %v5792_v31, 16  ;;  %v3989_v31 = vshll.u32 %v8025_v6, 16 }
  0xe0   : > { %6474 = vmatprep.mubr.msk.bf16.mxu0 %vm636_vm2, %v7082_v21  ;;  %v3954_v21 = vrot.slane %v3952_v1, 1 }
  0xe1   : > { %v1245_v27 = vsel %vm1220_vm3, %v1242_v34, %v1244_v16  ;;  %v3991_v40 = vrot.slane %v3989_v31, 1  ;;  %v1264_v31 = vrot.slane %v7728_v57, 1  ;;  %v8107_v57 = vld [vmem:[%s7452_s30 + $0x80] sm:$0xff]  }
  0xe2   : > { %v3955_v28 = vor.u32 %v3954_v21, %v3950_v42  ;;  %v1256_v21 = vrot.slane %v7679_v63, 1  ;;  %v8067_v63 = vld [vmem:[%s7452_s30 + $0x60] sm:$0xff]  }
  0xe5   : > { %6251 = vmatmul.mubr.msk.bf16.gmra.mrb[4].mxu1 %vm636_vm2, %v1229_v29  ;;  %v3959_v29 = vrot.slane %v3957_v10, 1 }
  0xe6   : > { %6254 = vmatprep.mubr.msk.bf16.mxu1 %vm636_vm2, %v1231_v58  ;;  %v8005_v58 = vld [vmem:[%s7452_s30 + $0x30] sm:$0xff]  }
  0xe7   : > { %6475 = vmatmul.mubr.msk.bf16.gmra.mrb[28].mxu0 %vm636_vm2, %v7083_v8  ;;  %v1247_v8 = vsel %vm1220_vm3, %v1244_v16, %v1246_v25  ;;  %v3960_v36 = vsel %vm439_vm1, %v3955_v28, %v3959_v29  ;;  %v3963_v7 = vor.u32 %v3961_v45, %v3959_v29  ;;  %v3993_v16 = vshrl.u32 %v8025_v6, 16  ;;  %v8062_v29 = vld [vmem:[%s7452_s30 + $0x58] sm:$0xff]  }
  0xe8   : > { %6478 = vmatprep.mubr.msk.bf16.mxu0 %vm636_vm2, %v7084_v32  ;;  %v7091_v32 = vld [vmem:[%s7452_s30 + $0xd0] sm:$0xff]  }
  0xed   : > { %6255 = vmatmul.mubr.msk.bf16.gmra.mrb[8].mxu1 %vm636_vm2, %v1233_v43  ;;  %v3973_v43 = vshll.u32 %v8005_v58, 16 }
  0xee   : > { %6258 = vmatprep.mubr.msk.bf16.mxu1 %vm636_vm2, %v1235_v41  ;;  %v1250_v41 = vrot.slane %v7644_v17, 1 }
  0xef   : > { %6479 = vmatmul.mubr.msk.bf16.gmra.mrb[32].mxu0 %vm636_vm2, %v7085_v62  ;;  %v3967_v62 = vrot.slane %v3965_v22, 1  ;;  %v3975_v44 = vrot.slane %v3973_v43, 1 }
  0xf0   : > { %6482 = vmatprep.mubr.msk.bf16.mxu0 %vm636_vm2, %v7086_v11  ;;  %v8020_v11 = vld [vmem:[%s7452_s30 + $0x38] sm:$0xff]   ;;  %v1253_v1 = vsel %vm1220_vm3, %v1250_v41, %v1252_v59 }
  0xf1   : > { %v3971_v13 = vor.u32 %v3969_v18, %v3967_v62  ;;  %v3968_v17 = vsel %vm439_vm1, %v3963_v7, %v3967_v62  ;;  %v3985_v50 = vshrl.u32 %v8020_v11, 16  ;;  %v4017_v62 = vshrl.u32 %v8062_v29, 16 }
  0xf2   : > { %v4021_v7 = vshll.u32 %v8067_v63, 16 }
  0xf5   : > { %6259 = vmatmul.mubr.msk.bf16.gmra.mrb[12].mxu1 %vm636_vm2, %v1237_v46  ;;  %v1251_v46 = vsel %vm1220_vm3, %v1248_v37, %v1250_v41  ;;  %v4013_v37 = vshll.u32 %v8062_v29, 16  ;;  %v1260_v41 = vrot.slane %v7706_v52, 1  ;;  %v8087_v52 = vld [vmem:[%s7452_s30 + $0x70] sm:$0xff]  }
  0xf6   : > { %6262 = vmatprep.mubr.msk.bf16.mxu1 %vm636_vm2, %v1239_v49  ;;  %v3981_v49 = vshll.u32 %v8020_v11, 16 }
  0xf7   : > { %6483 = vmatmul.mubr.msk.bf16.gmra.mrb[36].mxu0 %vm636_vm2, %v7087_v56  ;;  %v3977_v56 = vshrl.u32 %v8005_v58, 16 }
  0xf8   : > { %6486 = vmatprep.mubr.msk.bf16.mxu0 %vm636_vm2, %v7088_v20  ;;  %v3976_v20 = vsel %vm439_vm1, %v3971_v13, %v3975_v44  ;;  %v3983_v34 = vrot.slane %v3981_v49, 1  ;;  %v4015_v13 = vrot.slane %v4013_v37, 1 }
  0xf9   : > { %v3979_v33 = vor.u32 %v3977_v56, %v3975_v44  ;;  %v8082_v44 = vld [vmem:[%s7452_s30 + $0x68] sm:$0xff]  }
  0xfb   : > { %v3984_v19 = vsel %vm439_vm1, %v3979_v33, %v3983_v34  ;;  %v1266_v33 = vrot.slane %v7733_v60, 1 }
  0xfd   : > { %6263 = vmatmul.mubr.msk.bf16.gmra.mrb[16].mxu1 %vm636_vm2, %v1241_v39  ;;  %v8042_v39 = vld [vmem:[%s7452_s30 + $0x48] sm:$0xff]  }
  0xfe   : > { %6266 = vmatprep.mubr.msk.bf16.mxu1 %vm636_vm2, %v1243_v2  ;;  %v3987_v2 = vor.u32 %v3985_v50, %v3983_v34  ;;  %v3997_v47 = vshll.u32 %v8042_v39, 16  ;;  %v4001_v10 = vshrl.u32 %v8042_v39, 16  ;;  %v4037_v34 = vshll.u32 %v8087_v52, 16 }
  0xff   : > { %6487 = vmatmul.mubr.msk.bf16.gmra.mrb[40].mxu0 %vm636_vm2, %v7089_v9  ;;  %v8047_v9 = vld [vmem:[%s7452_s30 + $0x50] sm:$0xff]  }
 0x100   : > { %6490 = vmatprep.mubr.msk.bf16.mxu0 %vm636_vm2, %v7090_v5  ;;  %v1255_v5 = vsel %vm1220_vm3, %v1252_v59, %v1254_v61  ;;  %v3992_v42 = vsel %vm439_vm1, %v3987_v2, %v3991_v40  ;;  %v4005_v25 = vshll.u32 %v8047_v9, 16  ;;  %v3999_v28 = vrot.slane %v3997_v47, 1  ;;  %v8102_v2 = vld [vmem:[%s7452_s30 + $0x78] sm:$0xff]  }
 0x101   : > { %v4009_v18 = vshrl.u32 %v8047_v9, 16  ;;  %v4025_v59 = vshrl.u32 %v8067_v63, 16  ;;  %v4045_v60 = vshll.u32 %v8102_v2, 16 }
 0x102   : > { %v4003_v22 = vor.u32 %v4001_v10, %v3999_v28  ;;  %v4007_v45 = vrot.slane %v4005_v25, 1  ;;  %v1268_v25 = vrot.slane %v7748_v12, 1  ;;  %v8127_v12 = vld [vmem:[%s7452_s30 + $0x90] sm:$0xff]  }
 0x104   : > { %v4008_v43 = vsel %vm439_vm1, %v4003_v22, %v4007_v45 }
 0x105   : > { %6267 = vmatmul.mubr.msk.bf16.gmra.mrb[20].mxu1 %vm636_vm2, %v1245_v27  ;;  %v1258_v27 = vrot.slane %v7689_v15, 1 }
 0x106   : > { %6270 = vmatprep.mubr.msk.bf16.mxu1 %vm636_vm2, %v1247_v8  ;;  %v3995_v8 = vor.u32 %v3993_v16, %v3991_v40  ;;  %v1267_v16 = vsel %vm1220_vm3, %v1264_v31, %v1266_v33 }
 0x107   : > { %6491 = vmatmul.mubr.msk.bf16.gmra.mrb[44].mxu0 %vm636_vm2, %v7091_v32  ;;  %v1257_v32 = vsel %vm1220_vm3, %v1254_v61, %v1256_v21  ;;  %v1261_v49 = vsel %vm1220_vm3, %v1258_v27, %v1260_v41  ;;  %v4033_v61 = vshrl.u32 %v8082_v44, 16 }
 0x108   : > { %6496 = vmatprep.mubr.msk.bf16.mxu0 %vm636_vm2, %v3960_v36  ;;  %v1259_v36 = vsel %vm1220_vm3, %v1256_v21, %v1258_v27  ;;  %v4000_v15 = vsel %vm439_vm1, %v3995_v8, %v3999_v28  ;;  %v4041_v21 = vshrl.u32 %v8087_v52, 16  ;;  %v4049_v27 = vshrl.u32 %v8102_v2, 16 }
 0x109   : > { %v4053_v28 = vshll.u32 %v8107_v57, 16  ;;  %v4047_v8 = vrot.slane %v4045_v60, 1  ;;  %v8164_v60 = vld [vmem:[%s7452_s30 + $0xb0] sm:$0xff]  }
 0x10b   : > { %v4051_v37 = vor.u32 %v4049_v27, %v4047_v8 }
 0x10d   : > { %6271 = vmatmul.mubr.msk.bf16.gmra.mrb[24].mxu1 %vm636_vm2, %v1249_v23  ;;  %v1262_v23 = vrot.slane %v7715_v38, 1 }
 0x10e   : > { %6274 = vmatprep.mubr.msk.bf16.mxu1 %vm636_vm2, %v1251_v46  ;;  %v4011_v46 = vor.u32 %v4009_v18, %v4007_v45  ;;  %v1269_v45 = vsel %vm1220_vm3, %v1266_v33, %v1268_v25 }
 0x10f   : > { %6497 = vmatmul.mubr.msk.bf16.vlgmr.msra.gmra.mrb[0].mxu0 %vm636_vm2, %v3968_v17  ;;  %v4019_v17 = vor.u32 %v4017_v62, %v4015_v13  ;;  %v1263_v56 = vsel %vm1220_vm3, %v1260_v41, %v1262_v23  ;;  %v4057_v41 = vshrl.u32 %v8107_v57, 16 }
 0x110   : > { %6545 = vmatpush3.bf16.msra.mxu0 %v4621_v54  ;;  %6500 = vmatprep.mubr.msk.bf16.mxu0 %vm636_vm2, %v3976_v20  ;;  %v4023_v54 = vrot.slane %v4021_v7, 1  ;;  %v4029_v20 = vshll.u32 %v8082_v44, 16  ;;  %v4016_v38 = vsel %vm439_vm1, %v4011_v46, %v4015_v13  ;;  %v8139_v46 = vld [vmem:[%s7452_s30 + $0x98] sm:$0xff]  }
 0x112   : > { %v4024_v50 = vsel %vm439_vm1, %v4019_v17, %v4023_v54  ;;  %v4027_v40 = vor.u32 %v4025_v59, %v4023_v54  ;;  %v7109_v54 = vld [vmem:[%s7452_s30 + $0x1c] sm:$0xff]   ;;  %v4077_v59 = vshll.u32 %v8139_v46, 16 }
 0x115   : > { %6275 = vmatmul.mubr.msk.bf16.gmra.mrb[28].mxu1 %vm636_vm2, %v1253_v1  ;;  %v4031_v1 = vrot.slane %v4029_v20, 1 }
 0x116   : > { %6278 = vmatprep.mubr.msk.bf16.mxu1 %vm636_vm2, %v1255_v5  ;;  %v1265_v5 = vsel %vm1220_vm3, %v1262_v23, %v1264_v31  ;;  %v4069_v23 = vshll.u32 %v8127_v12, 16  ;;  %v4073_v31 = vshrl.u32 %v8127_v12, 16 }
 0x117   : > { %6501 = vmatmul.mubr.msk.bf16.gmra.mrb[4].mxu0 %vm636_vm2, %v3984_v19  ;;  %v4035_v47 = vor.u32 %v4033_v61, %v4031_v1  ;;  %v4039_v19 = vrot.slane %v4037_v34, 1  ;;  %v4081_v34 = vshrl.u32 %v8139_v46, 16 }
 0x118   : > { %6504 = vmatprep.mubr.msk.bf16.mxu0 %vm636_vm2, %v3992_v42  ;;  %v4032_v42 = vsel %vm439_vm1, %v4027_v40, %v4031_v1  ;;  %v4071_v20 = vrot.slane %v4069_v23, 1  ;;  %v4079_v1 = vrot.slane %v4077_v59, 1  ;;  %v8158_v40 = vld [vmem:[%s7452_s30 + $0xa8] sm:$0xff]  }
 0x119   : > { %v4040_v10 = vsel %vm439_vm1, %v4035_v47, %v4039_v19  ;;  %v4043_v22 = vor.u32 %v4041_v21, %v4039_v19  ;;  %v7113_v19 = vld [vmem:[%s7452_s30 + $0x2c] sm:$0xff]   ;;  %v4097_v27 = vshrl.u32 %v8158_v40, 16 }
 0x11a   : > { %v4075_v47 = vor.u32 %v4073_v31, %v4071_v20  ;;  %v7121_v59 = vld [vmem:[%s7452_s30 + $0x4c] sm:$0xff]  }
 0x11c   : > { %v4080_v21 = vsel %vm439_vm1, %v4075_v47, %v4079_v1 }
 0x11d   : > { %6279 = vmatmul.mubr.msk.bf16.gmra.mrb[32].mxu1 %vm636_vm2, %v1257_v32  ;;  %v8121_v32 = vld [vmem:[%s7452_s30 + $0x88] sm:$0xff]  }
 0x11e   : > { %6282 = vmatprep.mubr.msk.bf16.mxu1 %vm636_vm2, %v1259_v36  ;;  %v7105_v36 = vld [vmem:[%s7452_s30 + $0xc] sm:$0xff]   ;;  %v4061_v18 = vshll.u32 %v8121_v32, 16  ;;  %v4065_v7 = vshrl.u32 %v8121_v32, 16 }
 0x11f   : > { %6505 = vmatmul.mubr.msk.bf16.gmra.mrb[8].mxu0 %vm636_vm2, %v4000_v15  ;;  %v4055_v15 = vrot.slane %v4053_v28, 1  ;;  %v4101_v28 = vshll.u32 %v8164_v60, 16 }
 0x120   : > { %6508 = vmatprep.mubr.msk.bf16.mxu0 %vm636_vm2, %v4008_v43  ;;  %v4048_v43 = vsel %vm439_vm1, %v4043_v22, %v4047_v8  ;;  %v4063_v13 = vrot.slane %v4061_v18, 1  ;;  %v8176_v22 = vld [vmem:[%s7452_s30 + $0xb8] sm:$0xff]  }
 0x121   : > { %v4056_v62 = vsel %vm439_vm1, %v4051_v37, %v4055_v15  ;;  %v4059_v17 = vor.u32 %v4057_v41, %v4055_v15  ;;  %v7117_v37 = vld [vmem:[%s7452_s30 + $0x3c] sm:$0xff]   ;;  %v4103_v18 = vrot.slane %v4101_v28, 1  ;;  %v4109_v41 = vshll.u32 %v8176_v22, 16  ;;  %v4493_v28 = vld [vmem:[%s7452_s30 + $0x18] sm:$0xe] }
 0x125   : > { %6283 = vmatmul.mubr.msk.bf16.gmra.mrb[36].mxu1 %vm636_vm2, %v1261_v49  ;;  %v7107_v49 = vld [vmem:[%s7452_s30 + $0x14] sm:$0xff]  }
 0x126   : > { %6286 = vmatprep.mubr.msk.bf16.mxu1 %vm636_vm2, %v1263_v56  ;;  %v4067_v56 = vor.u32 %v4065_v7, %v4063_v13  ;;  %v4105_v7 = vshrl.u32 %v8164_v60, 16 }
 0x127   : > { %6509 = vmatmul.mubr.msk.bf16.gmra.mrb[12].mxu0 %vm636_vm2, %v4016_v38  ;;  %v8145_v38 = vld [vmem:[%s7452_s30 + $0xa0] sm:$0xff]  }
 0x128   : > { %6512 = vmatprep.mubr.msk.bf16.mxu0 %vm636_vm2, %v4024_v50  ;;  %v4064_v50 = vsel %vm439_vm1, %v4059_v17, %v4063_v13  ;;  %v4072_v61 = vsel %vm439_vm1, %v4067_v56, %v4071_v20  ;;  %v4085_v33 = vshll.u32 %v8145_v38, 16  ;;  %v4113_v13 = vshrl.u32 %v8176_v22, 16  ;;  %v7119_v56 = vld [vmem:[%s7452_s30 + $0x44] sm:$0xff]  }
 0x129   : > { %v4111_v17 = vrot.slane %v4109_v41, 1  ;;  %v4107_v20 = vor.u32 %v4105_v7, %v4103_v18  ;;  %v7129_v7 = vld [vmem:[%s7452_s30 + $0x6c] sm:$0xff]  }
 0x12d   : > { %6287 = vmatmul.mubr.msk.bf16.gmra.mrb[40].mxu1 %vm636_vm2, %v1265_v5  ;;  %v7111_v5 = vld [vmem:[%s7452_s30 + $0x24] sm:$0xff]  }
 0x12e   : > { %6290 = vmatprep.mubr.msk.bf16.mxu1 %vm636_vm2, %v1267_v16  ;;  %v4087_v16 = vrot.slane %v4085_v33, 1  ;;  %v4112_v33 = vsel %vm439_vm1, %v4107_v20, %v4111_v17  ;;  %v7132_v20 = vld [vmem:[%s7452_s30 + $0x7c] sm:$0xff]  }
 0x12f   : > { %6513 = vmatmul.mubr.msk.bf16.gmra.mrb[16].mxu0 %vm636_vm2, %v4032_v42  ;;  %v4093_v42 = vshll.u32 %v8158_v40, 16 }
 0x130   : > { %6516 = vmatprep.mubr.msk.bf16.mxu0 %vm636_vm2, %v4040_v10  ;;  %v4089_v10 = vshrl.u32 %v8145_v38, 16 }
 0x131   : > { %v4095_v8 = vrot.slane %v4093_v42, 1 }
 0x133   : > { %v4099_v15 = vor.u32 %v4097_v27, %v4095_v8 }
 0x135   : > { %6291 = vmatmul.mubr.msk.bf16.gmra.mrb[44].mxu1 %vm636_vm2, %v1269_v45  ;;  %v7115_v45 = vld [vmem:[%s7452_s30 + $0x34] sm:$0xff]   ;;  %v4104_v23 = vsel %vm439_vm1, %v4099_v15, %v4103_v18  ;;  %v5842_v15 = vcombine.low %v4493_v28, %v7975_v55  ;;  %v7127_v18 = vld [vmem:[%s7452_s30 + $0x64] sm:$0xff]   ;;  %v4518_v28 = vrot.slane %v8082_v44, 1 }
 0x136   : > { %6296 = vmatprep.mubr.msk.bf16.mxu1 %vm636_vm2, %v7105_v36  ;;  %v4091_v36 = vor.u32 %v4089_v10, %v4087_v16  ;;  %v7125_v10 = vld [vmem:[%s7452_s30 + $0x5c] sm:$0xff]  }
 0x137   : > { %6517 = vmatmul.mubr.msk.bf16.gmra.mrb[20].mxu0 %vm636_vm2, %v4048_v43  ;;  %v8182_v43 = vld [vmem:[%s7452_s30 + $0xc0] sm:$0xff]  }
 0x138   : > { %6520 = vmatprep.mubr.msk.bf16.mxu0 %vm636_vm2, %v4056_v62  ;;  %v4096_v62 = vsel %vm439_vm1, %v4091_v36, %v4095_v8 }
 0x13d   : > { %6297 = vmatmul.mubr.msk.bf16.vlgmr.msra.gmra.mrb[0].mxu1 %vm636_vm2, %v7107_v49  ;;  %v4117_v49 = vshll.u32 %v8182_v43, 16 }
 0x13e   : > { %6595 = vmatpush3.bf16.msra.mxu1 %v7435_v3  ;;  %6300 = vmatprep.mubr.msk.bf16.mxu1 %vm636_vm2, %v7109_v54  ;;  %v4083_v3 = vor.u32 %v4081_v34, %v4079_v1  ;;  %v8194_v54 = vld [vmem:[%s7452_s30 + $0xc8] sm:$0xff]   ;;  %v4121_v1 = vshrl.u32 %v8182_v43, 16 }
 0x13f   : > { %6521 = vmatmul.mubr.msk.bf16.gmra.mrb[24].mxu0 %vm636_vm2, %v4064_v50  ;;  %v4115_v50 = vor.u32 %v4113_v13, %v4111_v17  ;;  %v4119_v31 = vrot.slane %v4117_v49, 1  ;;  %v4125_v34 = vshll.u32 %v8194_v54, 16  ;;  %v4129_v47 = vshrl.u32 %v8194_v54, 16  ;;  %v7131_v17 = vld [vmem:[%s7452_s30 + $0x74] sm:$0xff]  }
 0x140   : > { %6524 = vmatprep.mubr.msk.bf16.mxu0 %vm636_vm2, %v4072_v61  ;;  %v4088_v25 = vsel %vm439_vm1, %v4083_v3, %v4087_v16  ;;  %v8200_v61 = vld [vmem:[%s7452_s30 + $0xd0] sm:$0xff]   ;;  %v4500_v13 = vrot.slane %v7988_v0, 1  ;;  %v4504_v0 = vrot.slane %v8005_v58, 1  ;;  %v4508_v58 = vrot.slane %v8025_v6, 1 }
 0x141   : > { %v4127_v3 = vrot.slane %v4125_v34, 1  ;;  %v7123_v16 = vld [vmem:[%s7452_s30 + $0x54] sm:$0xff]   ;;  %v4123_v42 = vor.u32 %v4121_v1, %v4119_v31  ;;  %v7134_v34 = vld [vmem:[%s7452_s30 + $0x8c] sm:$0xff]   ;;  %v4512_v6 = vrot.slane %v8047_v9, 1 }
 0x142   : > { %v7138_v9 = vld [vmem:[%s7452_s30 + $0xac] sm:$0xff]  }
 0x143   : > { %v4128_v8 = vsel %vm439_vm1, %v4123_v42, %v4127_v3  ;;  %v4516_v42 = vrot.slane %v8067_v63, 1  ;;  %v4520_v63 = vrot.slane %v8087_v52, 1  ;;  %v7141_v52 = vld [vmem:[%s7452_s30 + $0xc4] sm:$0xff]  }
 0x145   : > { %6301 = vmatmul.mubr.msk.bf16.gmra.mrb[4].mxu1 %vm636_vm2, %v7111_v5  ;;  %v4120_v5 = vsel %vm439_vm1, %v4115_v50, %v4119_v31  ;;  %v7133_v31 = vld [vmem:[%s7452_s30 + $0x84] sm:$0xff]  }
 0x146   : > { %6304 = vmatprep.mubr.msk.bf16.mxu1 %vm636_vm2, %v7113_v19  ;;  %v4133_v19 = vshll.u32 %v8200_v61, 16 }
 0x147   : > { %6525 = vmatmul.mubr.msk.bf16.gmra.mrb[28].mxu0 %vm636_vm2, %v4080_v21  ;;  %v8214_v21 = vld [vmem:[%s7452_s30 + $0xd8] ss:$0 sps:$4 sm:$0x11]  }
 0x148   : > { %6528 = vmatprep.mubr.msk.bf16.mxu0 %vm636_vm2, %v4088_v25  ;;  %v4131_v25 = vor.u32 %v4129_v47, %v4127_v3  ;;  %v4135_v27 = vrot.slane %v4133_v19, 1  ;;  %v4141_v36 = vshll.u32 %v8214_v21, 16  ;;  %v7136_v47 = vld [vmem:[%s7452_s30 + $0x9c] sm:$0xff]  }
 0x14d   : > { %6305 = vmatmul.mubr.msk.bf16.gmra.mrb[8].mxu1 %vm636_vm2, %v7115_v45  ;;  %v4137_v45 = vshrl.u32 %v8200_v61, 16 }
 0x14e   : > { %6308 = vmatprep.mubr.msk.bf16.mxu1 %vm636_vm2, %v7117_v37  ;;  %v4136_v37 = vsel %vm439_vm1, %v4131_v25, %v4135_v27 }
 0x14f   : > { %6529 = vmatmul.mubr.msk.bf16.gmra.mrb[32].mxu0 %vm636_vm2, %v4096_v62  ;;  %v4139_v41 = vor.u32 %v4137_v45, %v4135_v27  ;;  %v4143_v62 = vrot.slane %v4141_v36, 1  ;;  %v7139_v27 = vld [vmem:[%s7452_s30 + $0xb4] sm:$0xff]  }
 0x150   : > { %6532 = vmatprep.mubr.msk.bf16.mxu0 %vm636_vm2, %v4104_v23  ;;  %v4499_v23 = vrot.slane %v5842_v15, 1  ;;  %v7349_v36 = vld [vmem:[%s7452_s30 + $0x74] sm:$0xff]   ;;  %v4519_v15 = vsel %vm1220_vm3, %v4516_v42, %v4518_v28 }
 0x151   : > { %v4144_v49 = vsel %vm439_vm1, %v4139_v41, %v4143_v62  ;;  %v4522_v62 = vrot.slane %v8102_v2, 1 }
 0x152   : > { %v4501_v55 = vsel %vm1220_vm3, %v4499_v23, %v4500_v13 }
 0x155   : > { %6309 = vmatmul.mubr.msk.bf16.gmra.mrb[12].mxu1 %vm636_vm2, %v7119_v56  ;;  %v4502_v56 = vrot.slane %v8000_v26, 1  ;;  %v4506_v26 = vrot.slane %v8020_v11, 1  ;;  %v4510_v11 = vrot.slane %v8042_v39, 1  ;;  %v4514_v39 = vrot.slane %v8062_v29, 1  ;;  %v7140_v29 = vld [vmem:[%s7452_s30 + $0xbc] sm:$0xff]  }
 0x156   : > { %6312 = vmatprep.mubr.msk.bf16.mxu1 %vm636_vm2, %v7121_v59 }
 0x157   : > { %6533 = vmatmul.mubr.msk.bf16.gmra.mrb[36].mxu0 %vm636_vm2, %v4112_v33  ;;  %v4503_v59 = vsel %vm1220_vm3, %v4500_v13, %v4502_v56  ;;  %v4505_v50 = vsel %vm1220_vm3, %v4502_v56, %v4504_v0  ;;  %v4507_v33 = vsel %vm1220_vm3, %v4504_v0, %v4506_v26  ;;  %v4509_v1 = vsel %vm1220_vm3, %v4506_v26, %v4508_v58  ;;  %v7351_v56 = vld [vmem:[%s7452_s30 + $0x84] sm:$0xff]   ;;  %v7352_v26 = vld [vmem:[%s7452_s30 + $0x8c] sm:$0xff]  }
 0x158   : > { %6536 = vmatprep.mubr.msk.bf16.mxu0 %vm636_vm2, %v4120_v5  ;;  %v7135_v5 = vld [vmem:[%s7452_s30 + $0x94] sm:$0xff]   ;;  %v4511_v19 = vsel %vm1220_vm3, %v4508_v58, %v4510_v11  ;;  %v4513_v3 = vsel %vm1220_vm3, %v4510_v11, %v4512_v6  ;;  %v4517_v25 = vsel %vm1220_vm3, %v4514_v39, %v4516_v42  ;;  %v2418_v13 = vshrl.u32 %v7349_v36, 16 }
 0x159   : > { %v2442_v11 = vshrl.u32 %v7352_v26, 16  ;;  %v2454_v42 = vshll.u32 %v7809_v14, 16 }
 0x15d   : > { %6313 = vmatmul.mubr.msk.bf16.gmra.mrb[16].mxu1 %vm636_vm2, %v7123_v16  ;;  %v7137_v16 = vld [vmem:[%s7452_s30 + $0xa4] sm:$0xff]  }
 0x15e   : > { %6316 = vmatprep.mubr.msk.bf16.mxu1 %vm636_vm2, %v7125_v10  ;;  %v4515_v10 = vsel %vm1220_vm3, %v4512_v6, %v4514_v39 }
 0x15f   : > { %6537 = vmatmul.mubr.msk.bf16.gmra.mrb[40].mxu0 %vm636_vm2, %v4128_v8  ;;  %v7348_v8 = vld [vmem:[%s7452_s30 + $0x6c] sm:$0xff]  }
 0x160   : > { %6540 = vmatprep.mubr.msk.bf16.mxu0 %vm636_vm2, %v4136_v37  ;;  %v2410_v45 = vshrl.u32 %v7348_v8, 16  ;;  %v2414_v37 = vshll.u32 %v7349_v36, 16 }
 0x162   : > { %v2412_v41 = vor.u32 %v2410_v45, %v7648_v24  ;;  %v2416_v44 = vrot.slane %v2414_v37, 1  ;;  %v4523_v24 = vsel %vm1220_vm3, %v4520_v63, %v4522_v62  ;;  %v2456_v45 = vrot.slane %v2454_v42, 1 }
 0x165   : > { %6317 = vmatmul.mubr.msk.bf16.gmra.mrb[20].mxu1 %vm636_vm2, %v7127_v18  ;;  %v4521_v18 = vsel %vm1220_vm3, %v4518_v28, %v4520_v63  ;;  %v2462_v63 = vshll.u32 %v7812_v53, 16  ;;  %v2470_v53 = vshll.u32 %v7822_v51, 16 }
 0x166   : > { %6320 = vmatprep.mubr.msk.bf16.mxu1 %vm636_vm2, %v7129_v7  ;;  %v7350_v7 = vld [vmem:[%s7452_s30 + $0x7c] sm:$0xff]  }
 0x167   : > { %6541 = vmatmul.mubr.msk.bf16.gmra.mrb[44].mxu0 %vm636_vm2, %v4144_v49  ;;  %v2422_v23 = vshll.u32 %v7350_v7, 16  ;;  %v4524_v49 = vrot.slane %v8107_v57, 1  ;;  %v4526_v57 = vrot.slane %v8121_v32, 1 }
 0x168   : > { %6546 = vmatprep.mubr.msk.bf16.mxu0 %vm636_vm2, %v4501_v55  ;;  %v2417_v55 = vsel %vm439_vm1, %v2412_v41, %v2416_v44  ;;  %v7354_v41 = vld [vmem:[%s7452_s30 + $0xa4] sm:$0xff]  }
 0x169   : > { %v2424_v0 = vrot.slane %v2422_v23, 1  ;;  %v4525_v2 = vsel %vm1220_vm3, %v4522_v62, %v4524_v49  ;;  %v2474_v62 = vshrl.u32 %v7822_v51, 16  ;;  %v4538_v51 = vrot.slane %v8176_v22, 1 }
 0x16d   : > { %6321 = vmatmul.mubr.msk.bf16.gmra.mrb[24].mxu1 %vm636_vm2, %v7131_v17  ;;  %v2426_v17 = vshrl.u32 %v7350_v7, 16  ;;  %v2478_v7 = vshll.u32 %v7828_v48, 16  ;;  %v2486_v48 = vshll.u32 %v7841_v4, 16 }
 0x16e   : > { %6324 = vmatprep.mubr.msk.bf16.mxu1 %vm636_vm2, %v7132_v20  ;;  %v2430_v20 = vshll.u32 %v7351_v56, 16 }
 0x16f   : > { %6547 = vmatmul.mubr.msk.bf16.vlgmr.msra.gmra.mrb[0].mxu0 %vm636_vm2, %v4503_v59  ;;  %v2420_v59 = vor.u32 %v2418_v13, %v2416_v44  ;;  %v2466_v44 = vshrl.u32 %v7354_v41, 16  ;;  %v2488_v22 = vrot.slane %v2486_v48, 1 }
 0x170   : > { %6550 = vmatprep.mubr.msk.bf16.mxu0 %vm636_vm2, %v4505_v50  ;;  %v2428_v50 = vor.u32 %v2426_v17, %v2424_v0 }
 0x171   : > { %v2425_v58 = vsel %vm439_vm1, %v2420_v59, %v2424_v0  ;;  %v2490_v59 = vshrl.u32 %v7841_v4, 16  ;;  %v4542_v4 = vrot.slane %v8194_v54, 1 }
 0x175   : > { %6325 = vmatmul.mubr.msk.bf16.gmra.mrb[28].mxu1 %vm636_vm2, %v7133_v31  ;;  %v2432_v31 = vrot.slane %v2430_v20, 1  ;;  %v7355_v20 = vld [vmem:[%s7452_s30 + $0xb4] sm:$0xff]  }
 0x176   : > { %6328 = vmatprep.mubr.msk.bf16.mxu1 %vm636_vm2, %v7134_v34  ;;  %v2438_v34 = vshll.u32 %v7352_v26, 16 }
 0x177   : > { %6551 = vmatmul.mubr.msk.bf16.gmra.mrb[4].mxu0 %vm636_vm2, %v4507_v33  ;;  %v4528_v33 = vrot.slane %v8127_v12, 1  ;;  %v4530_v12 = vrot.slane %v8139_v46, 1 }
 0x178   : > { %6554 = vmatprep.mubr.msk.bf16.mxu0 %vm636_vm2, %v4509_v1  ;;  %v2434_v1 = vshrl.u32 %v7351_v56, 16  ;;  %v4540_v56 = vrot.slane %v8182_v43, 1  ;;  %v2492_v43 = vor.u32 %v2490_v59, %v2488_v22 }
 0x179   : > { %v4529_v32 = vsel %vm1220_vm3, %v4526_v57, %v4528_v33  ;;  %v4531_v8 = vsel %vm1220_vm3, %v4528_v33, %v4530_v12 }
 0x17d   : > { %6329 = vmatmul.mubr.msk.bf16.gmra.mrb[32].mxu1 %vm636_vm2, %v7135_v5  ;;  %v2433_v5 = vsel %vm439_vm1, %v2428_v50, %v2432_v31 }
 0x17e   : > { %6332 = vmatprep.mubr.msk.bf16.mxu1 %vm636_vm2, %v7136_v47  ;;  %v7353_v47 = vld [vmem:[%s7452_s30 + $0x94] sm:$0xff]  }
 0x17f   : > { %6555 = vmatmul.mubr.msk.bf16.gmra.mrb[8].mxu0 %vm636_vm2, %v4511_v19  ;;  %v2446_v6 = vshll.u32 %v7353_v47, 16  ;;  %v4527_v19 = vsel %vm1220_vm3, %v4524_v49, %v4526_v57 }
 0x180   : > { %6558 = vmatprep.mubr.msk.bf16.mxu0 %vm636_vm2, %v4513_v3  ;;  %v2440_v3 = vrot.slane %v2438_v34, 1  ;;  %v4544_v34 = vrot.slane %v8200_v61, 1  ;;  %v4546_v61 = vrot.slane %v8214_v21, 1 }
 0x182   : > { %v2444_v39 = vor.u32 %v2442_v11, %v2440_v3  ;;  %v4543_v11 = vsel %vm1220_vm3, %v4540_v56, %v4542_v4 }
 0x185   : > { %6333 = vmatmul.mubr.msk.bf16.gmra.mrb[36].mxu1 %vm636_vm2, %v7137_v16  ;;  %v2436_v16 = vor.u32 %v2434_v1, %v2432_v31  ;;  %v4541_v31 = vsel %vm1220_vm3, %v4538_v51, %v4540_v56  ;;  %v2502_v1 = vshll.u32 %v7857_v35, 16 }
 0x186   : > { %6336 = vmatprep.mubr.msk.bf16.mxu1 %vm636_vm2, %v7138_v9  ;;  %v2448_v9 = vrot.slane %v2446_v6, 1 }
 0x187   : > { %6559 = vmatmul.mubr.msk.bf16.gmra.mrb[12].mxu0 %vm636_vm2, %v4515_v10  ;;  %v2441_v10 = vsel %vm439_vm1, %v2436_v16, %v2440_v3  ;;  %v2504_v54 = vrot.slane %v2502_v1, 1 }
 0x188   : > { %6562 = vmatprep.mubr.msk.bf16.mxu0 %vm636_vm2, %v4517_v25  ;;  %v4532_v25 = vrot.slane %v8145_v38, 1  ;;  %v2449_v28 = vsel %vm439_vm1, %v2444_v39, %v2448_v9  ;;  %v2464_v38 = vrot.slane %v2462_v63, 1 }
 0x18a   : > { %v4533_v46 = vsel %vm1220_vm3, %v4530_v12, %v4532_v25  ;;  %v2468_v49 = vor.u32 %v2466_v44, %v2464_v38  ;;  %v8406_v44 = vld [vmem:[%s8784_s2] ss:$0 sm:$0xff] }
 0x18d   : > { %6337 = vmatmul.mubr.msk.bf16.gmra.mrb[40].mxu1 %vm636_vm2, %v7139_v27  ;;  %v2450_v27 = vshrl.u32 %v7353_v47, 16  ;;  %v4545_v47 = vsel %vm1220_vm3, %v4542_v4, %v4544_v34 }
 0x18e   : > { %6340 = vmatprep.mubr.msk.bf16.mxu1 %vm636_vm2, %v7140_v29  ;;  %v2458_v29 = vshrl.u32 %v7809_v14, 16  ;;  %v4534_v14 = vrot.slane %v8158_v40, 1  ;;  %v2472_v40 = vrot.slane %v2470_v53, 1 }
 0x18f   : > { %6563 = vmatmul.mubr.msk.bf16.gmra.mrb[16].mxu0 %vm636_vm2, %v4519_v15  ;;  %v2452_v36 = vor.u32 %v2450_v27, %v2448_v9 }
 0x190   : > { %6566 = vmatprep.mubr.msk.bf16.mxu0 %vm636_vm2, %v4521_v18  ;;  %v2460_v37 = vor.u32 %v2458_v29, %v2456_v45  ;;  %v4536_v18 = vrot.slane %v8164_v60, 1  ;;  %v4535_v23 = vsel %vm1220_vm3, %v4532_v25, %v4534_v14  ;;  %v2476_v60 = vor.u32 %v2474_v62, %v2472_v40 }
 0x191   : > { %v2457_v15 = vsel %vm439_vm1, %v2452_v36, %v2456_v45  ;;  %v2473_v17 = vsel %vm439_vm1, %v2468_v49, %v2472_v40 }
 0x192   : > { %v4537_v13 = vsel %vm1220_vm3, %v4534_v14, %v4536_v18  ;;  %v4539_v50 = vsel %vm1220_vm3, %v4536_v18, %v4538_v51 }
 0x195   : > { %6341 = vmatmul.mubr.msk.bf16.gmra.mrb[44].mxu1 %vm636_vm2, %v7141_v52  ;;  %v2465_v52 = vsel %vm439_vm1, %v2460_v37, %v2464_v38 }
 0x196   : > { %6370 = vmatprep.mubr.msk.bf16.mxu1 %vm636_vm2, %v2417_v55  ;;  %v2480_v55 = vrot.slane %v2478_v7, 1  ;;  %v8411_v7 = vld [vmem:[%s8785_s3] ss:$0 sm:$0xff] }
 0x197   : > { %6567 = vmatmul.mubr.msk.bf16.gmra.mrb[20].mxu0 %vm636_vm2, %v4523_v24  ;;  %v2482_v24 = vshrl.u32 %v7355_v20, 16 }
 0x198   : > { %6570 = vmatprep.mubr.msk.bf16.mxu0 %vm636_vm2, %v4525_v2  ;;  %v2481_v0 = vsel %vm439_vm1, %v2476_v60, %v2480_v55  ;;  %v2494_v2 = vshll.u32 %v7847_v30, 16 }
 0x199   : > { %v2484_v57 = vor.u32 %v2482_v24, %v2480_v55 }
 0x19a   : > { %v2496_v26 = vrot.slane %v2494_v2, 1 }
 0x19b   : > { %v2489_v30 = vsel %vm439_vm1, %v2484_v57, %v2488_v22 }
 0x19d   : > { %6371 = vmatmul.mubr.msk.bf16.vlgmr.msra.gmra.mrb[24].mxu1 %vm636_vm2, %v2425_v58  ;;  %v7356_v58 = vld [vmem:[%s7452_s30 + $0xc4] sm:$0xff]  }
 0x19e   : > { %6374 = vmatprep.mubr.msk.bf16.mxu1 %vm636_vm2, %v2433_v5  ;;  %v2498_v33 = vshrl.u32 %v7356_v58, 16  ;;  %v2497_v5 = vsel %vm439_vm1, %v2492_v43, %v2496_v26 }
 0x19f   : > { %6571 = vmatmul.mubr.msk.bf16.gmra.mrb[24].mxu0 %vm636_vm2, %v4527_v19  ;;  %v4547_v19 = vsel %vm1220_vm3, %v4544_v34, %v4546_v61 }
 0x1a0   : > { %6574 = vmatprep.mubr.msk.bf16.mxu0 %vm636_vm2, %v4529_v32  ;;  %v2500_v6 = vor.u32 %v2498_v33, %v2496_v26 }
 0x1a2   : > { %v2505_v35 = vsel %vm439_vm1, %v2500_v6, %v2504_v54 }
 0x1a5   : > { %6375 = vmatmul.mubr.msk.bf16.gmra.mrb[28].mxu1 %vm636_vm2, %v2441_v10 }
 0x1a6   : > { %6378 = vmatprep.mubr.msk.bf16.mxu1 %vm636_vm2, %v2449_v28 }
 0x1a7   : > { %6575 = vmatmul.mubr.msk.bf16.gmra.mrb[28].mxu0 %vm636_vm2, %v4531_v8 }
 0x1a8   : > { %6578 = vmatprep.mubr.msk.bf16.mxu0 %vm636_vm2, %v4533_v46 }
 0x1ad   : > { %6379 = vmatmul.mubr.msk.bf16.gmra.mrb[32].mxu1 %vm636_vm2, %v2457_v15 }
 0x1ae   : > { %6382 = vmatprep.mubr.msk.bf16.mxu1 %vm636_vm2, %v2465_v52 }
 0x1af   : > { %6579 = vmatmul.mubr.msk.bf16.gmra.mrb[32].mxu0 %vm636_vm2, %v4535_v23 }
 0x1b0   : > { %6582 = vmatprep.mubr.msk.bf16.mxu0 %vm636_vm2, %v4537_v13 }
 0x1b5   : > { %6383 = vmatmul.mubr.msk.bf16.gmra.mrb[36].mxu1 %vm636_vm2, %v2473_v17 }
 0x1b6   : > { %6386 = vmatprep.mubr.msk.bf16.mxu1 %vm636_vm2, %v2481_v0 }
 0x1b7   : > { %6583 = vmatmul.mubr.msk.bf16.gmra.mrb[36].mxu0 %vm636_vm2, %v4539_v50 }
 0x1b8   : > { %6586 = vmatprep.mubr.msk.bf16.mxu0 %vm636_vm2, %v4541_v31 }
 0x1bd   : > { %6387 = vmatmul.mubr.msk.bf16.gmra.mrb[40].mxu1 %vm636_vm2, %v2489_v30 }
 0x1be   : > { %6390 = vmatprep.mubr.msk.bf16.mxu1 %vm636_vm2, %v2497_v5 }
 0x1bf   : > { %6587 = vmatmul.mubr.msk.bf16.gmra.mrb[40].mxu0 %vm636_vm2, %v4543_v11 }
 0x1c0   : > { %6590 = vmatprep.mubr.msk.bf16.mxu0 %vm636_vm2, %v4545_v47 }
 0x1c5   : > { %6391 = vmatmul.mubr.msk.bf16.gmra.mrb[44].mxu1 %vm636_vm2, %v2505_v35 }
 0x1c7   : > { %6591 = vmatmul.mubr.msk.bf16.gmra.mrb[44].mxu0 %vm636_vm2, %v4547_v19 }
 0x210   : > { %v6298_v3 = vpop.f32.mrb[0].mxu1 }
 0x211   : > { %v1897_v32 = vpop.f32.mrb[1].mxu1 }
 0x212   : > { %v6299_v16 = vpop.f32.mrb[2].mxu1 }
 0x213   : > { %v1900_v39 = vpop.f32.mrb[3].mxu1 }
 0x218   : > { %v6302_v9 = vpop.f32.mrb[4].mxu1 }
 0x219   : > { %v1913_v12 = vpop.f32.mrb[5].mxu1 }
 0x21a   : > { %v6303_v42 = vpop.f32.mrb[6].mxu1 }
 0x21b   : > { %v1916_v10 = vpop.f32.mrb[7].mxu1 }
 0x220   : > { %v8371_v25 = vpop.f32.mrb[8].mxu1 }
 0x221   : > { %v8373_v27 = vpop.f32.mrb[9].mxu1 }
 0x222   : > { %v8375_v21 = vpop.f32.mrb[10].mxu1 }
 0x223   : > { %v8377_v28 = vpop.f32.mrb[11].mxu1 }
 0x228   : > { %v8379_v29 = vpop.f32.mrb[12].mxu1 }
 0x229   : > { %v8381_v63 = vpop.f32.mrb[13].mxu1 }
 0x22a   : > { %v8383_v8 = vpop.f32.mrb[14].mxu1 }
 0x22b   : > { %v8385_v45 = vpop.f32.mrb[15].mxu1 }
 0x230   : > { %v8387_v46 = vpop.f32.mrb[16].mxu1 }
 0x231   : > { %v8389_v36 = vpop.f32.mrb[17].mxu1 }
 0x232   : > { %v8391_v37 = vpop.f32.mrb[18].mxu1 }
 0x233   : > { %v8393_v38 = vpop.f32.mrb[19].mxu1 }
 0x238   : > { %v8395_v14 = vpop.f32.mrb[20].mxu1 }
 0x239   : > { %v8397_v53 = vpop.f32.mrb[21].mxu1 }
 0x23a   : > { %v8399_v15 = vpop.f32.mrb[22].mxu1 }
 0x23b   : > { %v8401_v18 = vpop.f32.mrb[23].mxu1 }
 0x242   : > { %v6548_v41 = vpop.f32.mrb[0].mxu0 }
 0x243   : > { %v6596_v52 = vadd.f32 %v6548_v41, %v6298_v3  ;;  %v4657_v62 = vpop.f32.mrb[1].mxu0 }
 0x244   : > { %v6597_v23 = vadd.f32 %v4657_v62, %v1897_v32  ;;  %v6549_v40 = vpop.f32.mrb[2].mxu0 }
 0x245   : > { %v4905_v13 = vmul.f32 %v6596_v52, %v8406_v44  ;;  %v6598_v49 = vadd.f32 %v6549_v40, %v6299_v16  ;;  %v4660_v60 = vpop.f32.mrb[3].mxu0 }
 0x246   : > { %v4903_v55 = vmul.f32 %v6597_v23, %v8406_v44  ;;  %v6599_v51 = vadd.f32 %v4660_v60, %v1900_v39 }
 0x247   : > { %v8416_v48 = vadd.f32 %v8411_v7, %v4905_v13  ;;  %v4906_v17 = vmul.f32 %v6598_v49, %v8406_v44 }
 0x248   : > { %v8420_v56 = vadd.f32 %v8411_v7, %v4903_v55  ;;  %v4904_v20 = vmul.f32 %v6599_v51, %v8406_v44 }
 0x249   : > { %v5871_v24 = vmul.f32 -1.442695, %v8416_v48  ;;  %v8425_v0 = vadd.f32 %v8411_v7, %v4906_v17 }
 0x24a   : > { %v5869_v59 = vmul.f32 -1.442695, %v8420_v56  ;;  %v8429_v2 = vadd.f32 %v8411_v7, %v4904_v20  ;;  %v6552_v50 = vpop.f32.mrb[4].mxu0 }
 0x24b   : > { %7142 = vpow2.f32 %v5871_v24  ;;  %v5872_v22 = vmul.f32 -1.442695, %v8425_v0  ;;  %v6600_v31 = vadd.f32 %v6552_v50, %v6302_v9  ;;  %v4673_v57 = vpop.f32.mrb[5].mxu0 }
 0x24c   : > { %7144 = vpow2.f32 %v5869_v59  ;;  %v5870_v43 = vmul.f32 -1.442695, %v8429_v2  ;;  %v6601_v26 = vadd.f32 %v4673_v57, %v1913_v12  ;;  %v6553_v4 = vpop.f32.mrb[6].mxu0 }
 0x24d   : > { %7146 = vpow2.f32 %v5872_v22  ;;  %v4909_v30 = vmul.f32 %v6600_v31, %v8406_v44  ;;  %v6602_v34 = vadd.f32 %v6553_v4, %v6303_v42  ;;  %v4676_v58 = vpop.f32.mrb[7].mxu0 }
 0x24e   : > { %7148 = vpow2.f32 %v5870_v43  ;;  %v4907_v33 = vmul.f32 %v6601_v26, %v8406_v44  ;;  %v6603_v1 = vadd.f32 %v4676_v58, %v1916_v10 }
 0x24f   : > { %v8436_v5 = vadd.f32 %v8411_v7, %v4909_v30  ;;  %v4910_v11 = vmul.f32 %v6602_v34, %v8406_v44 }
 0x250   : > { %v8440_v47 = vadd.f32 %v8411_v7, %v4907_v33  ;;  %v4908_v6 = vmul.f32 %v6603_v1, %v8406_v44 }
 0x251   : > { %v5875_v54 = vmul.f32 -1.442695, %v8436_v5  ;;  %v8445_v61 = vadd.f32 %v8411_v7, %v4910_v11 }
 0x252   : > { %v5873_v35 = vmul.f32 -1.442695, %v8440_v47  ;;  %v8449_v19 = vadd.f32 %v8411_v7, %v4908_v6  ;;  %v6556_v3 = vpop.f32.mrb[8].mxu0 }
 0x253   : > { %7150 = vpow2.f32 %v5875_v54  ;;  %v5876_v32 = vmul.f32 -1.442695, %v8445_v61  ;;  %v6604_v16 = vadd.f32 %v6556_v3, %v8371_v25  ;;  %v4689_v39 = vpop.f32.mrb[9].mxu0 }
 0x254   : > { %7152 = vpow2.f32 %v5873_v35  ;;  %v5874_v9 = vmul.f32 -1.442695, %v8449_v19  ;;  %v6605_v12 = vadd.f32 %v4689_v39, %v8373_v27  ;;  %v6557_v42 = vpop.f32.mrb[10].mxu0 }
 0x255   : > { %v7143_v10 = vpop.eup %7142  ;;  %7154 = vpow2.f32 %v5876_v32  ;;  %v4913_v41 = vmul.f32 %v6604_v16, %v8406_v44  ;;  %v6606_v52 = vadd.f32 %v6557_v42, %v8375_v21  ;;  %v4692_v62 = vpop.f32.mrb[11].mxu0 }
 0x256   : > { %v7145_v23 = vpop.eup %7144  ;;  %v5152_v40 = vadd.f32 1.0, %v7143_v10  ;;  %7156 = vpow2.f32 %v5874_v9  ;;  %v4911_v13 = vmul.f32 %v6605_v12, %v8406_v44  ;;  %v6607_v25 = vadd.f32 %v4692_v62, %v8377_v28 }
 0x257   : > { %v7147_v49 = vpop.eup %7146  ;;  %v5150_v60 = vadd.f32 1.0, %v7145_v23  ;;  %v8460_v55 = vadd.f32 %v8411_v7, %v4913_v41  ;;  %v4914_v27 = vmul.f32 %v6606_v52, %v8406_v44 }
 0x258   : > { %v7149_v51 = vpop.eup %7148  ;;  %7158 = vrcp.f32 %v5152_v40  ;;  %v5153_v17 = vadd.f32 1.0, %v7147_v49  ;;  %v8464_v21 = vadd.f32 %v8411_v7, %v4911_v13  ;;  %v4912_v20 = vmul.f32 %v6607_v25, %v8406_v44 }
 0x259   : > { %7160 = vrcp.f32 %v5150_v60  ;;  %v5151_v24 = vadd.f32 1.0, %v7149_v51  ;;  %v5879_v59 = vmul.f32 -1.442695, %v8460_v55  ;;  %v8469_v28 = vadd.f32 %v8411_v7, %v4914_v27 }
 0x25a   : > { %7162 = vrcp.f32 %v5153_v17  ;;  %v5877_v50 = vmul.f32 -1.442695, %v8464_v21  ;;  %v8473_v22 = vadd.f32 %v8411_v7, %v4912_v20  ;;  %v6560_v31 = vpop.f32.mrb[12].mxu0 }
 0x25b   : > { %7164 = vrcp.f32 %v5151_v24  ;;  %v5880_v57 = vmul.f32 -1.442695, %v8469_v28  ;;  %v6608_v43 = vadd.f32 %v6560_v31, %v8379_v29  ;;  %v4705_v26 = vpop.f32.mrb[13].mxu0 }
 0x25c   : > { %7166 = vpow2.f32 %v5879_v59  ;;  %v5878_v4 = vmul.f32 -1.442695, %v8473_v22  ;;  %v6609_v30 = vadd.f32 %v4705_v26, %v8381_v63  ;;  %v6561_v34 = vpop.f32.mrb[14].mxu0 }
 0x25d   : > { %v7151_v58 = vpop.eup %7150  ;;  %7168 = vpow2.f32 %v5877_v50  ;;  %v4917_v33 = vmul.f32 %v6608_v43, %v8406_v44  ;;  %v6610_v1 = vadd.f32 %v6561_v34, %v8383_v8  ;;  %v4708_v11 = vpop.f32.mrb[15].mxu0 }
 0x25e   : > { %v7153_v6 = vpop.eup %7152  ;;  %v5156_v54 = vadd.f32 1.0, %v7151_v58  ;;  %7170 = vpow2.f32 %v5880_v57  ;;  %v4915_v29 = vmul.f32 %v6609_v30, %v8406_v44  ;;  %v6611_v35 = vadd.f32 %v4708_v11, %v8385_v45 }
 0x25f   : > { %v7155_v3 = vpop.eup %7154  ;;  %v5154_v32 = vadd.f32 1.0, %v7153_v6  ;;  %7172 = vpow2.f32 %v5878_v4  ;;  %v8485_v63 = vadd.f32 %v8411_v7, %v4917_v33  ;;  %v4918_v16 = vmul.f32 %v6610_v1, %v8406_v44 }
 0x260   : > { %v7157_v39 = vpop.eup %7156  ;;  %7174 = vrcp.f32 %v5156_v54  ;;  %v5157_v8 = vadd.f32 1.0, %v7155_v3  ;;  %v8489_v9 = vadd.f32 %v8411_v7, %v4915_v29  ;;  %v4916_v12 = vmul.f32 %v6611_v35, %v8406_v44 }
 0x261   : > { %7176 = vrcp.f32 %v5154_v32  ;;  %v5155_v42 = vadd.f32 1.0, %v7157_v39  ;;  %v5883_v45 = vmul.f32 -1.442695, %v8485_v63  ;;  %v8494_v10 = vadd.f32 %v8411_v7, %v4918_v16 }
 0x262   : > { %v7159_v41 = vpop.eup %7158  ;;  %7178 = vrcp.f32 %v5157_v8  ;;  %v5881_v52 = vmul.f32 -1.442695, %v8489_v9  ;;  %v8503_v62 = vadd.f32 %v8411_v7, %v4916_v12  ;;  %v6564_v23 = vpop.f32.mrb[16].mxu0 }
 0x263   : > { %v7161_v40 = vpop.eup %7160  ;;  %v5296_v13 = vmul.f32 %v7159_v41, %v8416_v48  ;;  %7180 = vrcp.f32 %v5155_v42  ;;  %v5884_v25 = vmul.f32 -1.442695, %v8494_v10  ;;  %v6612_v49 = vadd.f32 %v6564_v23, %v8387_v46  ;;  %v4721_v60 = vpop.f32.mrb[17].mxu0 }
 0x264   : > { %v7163_v27 = vpop.eup %7162  ;;  %v5294_v51 = vmul.f32 %v7161_v40, %v8420_v56  ;;  %7182 = vpow2.f32 %v5883_v45  ;;  %v5882_v17 = vmul.f32 -1.442695, %v8503_v62  ;;  %v6613_v20 = vadd.f32 %v4721_v60, %v8389_v36  ;;  %v6565_v24 = vpop.f32.mrb[18].mxu0 }
 0x265   : > { %v7165_v59 = vpop.eup %7164  ;;  %5344 = vst [vmem:[%s8499_s27 + $0x10] sm:$0xff] %v5296_v13  ;;  %v5297_v48 = vmul.f32 %v7163_v27, %v8425_v0  ;;  %7184 = vpow2.f32 %v5881_v52  ;;  %v4921_v50 = vmul.f32 %v6612_v49, %v8406_v44  ;;  %v6614_v46 = vadd.f32 %v6565_v24, %v8391_v37  ;;  %v4724_v31 = vpop.f32.mrb[19].mxu0 }
 0x266   : > { %v7167_v57 = vpop.eup %7166  ;;  %5342 = vst [vmem:[%s8499_s27] sm:$0xff] %v5294_v51  ;;  %v5295_v56 = vmul.f32 %v7165_v59, %v8429_v2  ;;  %7186 = vpow2.f32 %v5884_v25  ;;  %v4919_v36 = vmul.f32 %v6613_v20, %v8406_v44  ;;  %v6615_v43 = vadd.f32 %v4724_v31, %v8393_v38 }
 0x267   : > { %v7169_v26 = vpop.eup %7168  ;;  %5345 = vst [vmem:[%s8499_s27 + $0x18] sm:$0xff] %v5297_v48  ;;  %v5160_v4 = vadd.f32 1.0, %v7167_v57  ;;  %7188 = vpow2.f32 %v5882_v17  ;;  %v8521_v0 = vadd.f32 %v8411_v7, %v4921_v50  ;;  %v4922_v30 = vmul.f32 %v6614_v46, %v8406_v44 }
 0x268   : > { %v7171_v37 = vpop.eup %7170  ;;  %5343 = vst [vmem:[%s8499_s27 + $0x8] sm:$0xff] %v5295_v56  ;;  %v5158_v34 = vadd.f32 1.0, %v7169_v26  ;;  %v8526_v58 = vadd.f32 %v8411_v7, %v4919_v36  ;;  %v4920_v2 = vmul.f32 %v6615_v43, %v8406_v44 }
 0x269   : > { %v7173_v33 = vpop.eup %7172  ;;  %7190 = vrcp.f32 %v5160_v4  ;;  %v5161_v38 = vadd.f32 1.0, %v7171_v37  ;;  %v5887_v1 = vmul.f32 -1.442695, %v8521_v0  ;;  %v8531_v11 = vadd.f32 %v8411_v7, %v4922_v30 }
 0x26a   : > { %v7175_v6 = vpop.eup %7174  ;;  %7192 = vrcp.f32 %v5158_v34  ;;  %v5159_v54 = vadd.f32 1.0, %v7173_v33  ;;  %v5885_v29 = vmul.f32 -1.442695, %v8526_v58  ;;  %v8535_v35 = vadd.f32 %v8411_v7, %v4920_v2  ;;  %v6568_v3 = vpop.f32.mrb[20].mxu0 }
 0x26b   : > { %v7177_v32 = vpop.eup %7176  ;;  %v5300_v16 = vmul.f32 %v7175_v6, %v8436_v5  ;;  %7194 = vrcp.f32 %v5161_v38  ;;  %v5888_v39 = vmul.f32 -1.442695, %v8531_v11  ;;  %v6616_v8 = vadd.f32 %v6568_v3, %v8395_v14  ;;  %v4737_v12 = vpop.f32.mrb[21].mxu0 }
 0x26c   : > { %v7179_v42 = vpop.eup %7178  ;;  %v5298_v45 = vmul.f32 %v7177_v32, %v8440_v47  ;;  %7196 = vrcp.f32 %v5159_v54  ;;  %v5886_v41 = vmul.f32 -1.442695, %v8535_v35  ;;  %v6617_v52 = vadd.f32 %v4737_v12, %v8397_v53  ;;  %v6569_v23 = vpop.f32.mrb[22].mxu0 }
 0x26d   : > { %v7181_v40 = vpop.eup %7180  ;;  %5348 = vst [vmem:[%s8499_s27 + $0x30] sm:$0xff] %v5300_v16  ;;  %v5301_v5 = vmul.f32 %v7179_v42, %v8445_v61  ;;  %7198 = vpow2.f32 %v5887_v1  ;;  %v4925_v13 = vmul.f32 %v6616_v8, %v8406_v44  ;;  %v6618_v14 = vadd.f32 %v6569_v23, %v8399_v15  ;;  %v4740_v25 = vpop.f32.mrb[23].mxu0 }
 0x26e   : > { %v7183_v49 = vpop.eup %7182  ;;  %5346 = vst [vmem:[%s8499_s27 + $0x20] sm:$0xff] %v5298_v45  ;;  %v5299_v47 = vmul.f32 %v7181_v40, %v8449_v19  ;;  %7200 = vpow2.f32 %v5885_v29  ;;  %v4923_v53 = vmul.f32 %v6617_v52, %v8406_v44  ;;  %v6619_v60 = vadd.f32 %v4740_v25, %v8401_v18 }
 0x26f   : > { %v7185_v27 = vpop.eup %7184  ;;  %5349 = vst [vmem:[%s8499_s27 + $0x38] sm:$0xff] %v5301_v5  ;;  %v5164_v51 = vadd.f32 1.0, %v7183_v49  ;;  %7202 = vpow2.f32 %v5888_v39  ;;  %v8553_v61 = vadd.f32 %v8411_v7, %v4925_v13  ;;  %v4926_v15 = vmul.f32 %v6618_v14, %v8406_v44 }
 0x270   : > { %v6372_v17 = vpop.f32.mrb[24].mxu1  ;;  %v7187_v20 = vpop.eup %7186  ;;  %5347 = vst [vmem:[%s8499_s27 + $0x28] sm:$0xff] %v5299_v47  ;;  %v5162_v24 = vadd.f32 1.0, %v7185_v27  ;;  %7204 = vpow2.f32 %v5886_v41  ;;  %v8558_v19 = vadd.f32 %v8411_v7, %v4923_v53  ;;  %v4924_v59 = vmul.f32 %v6619_v60, %v8406_v44 }
 0x271   : > { %v2711_v18 = vpop.f32.mrb[25].mxu1  ;;  %v7189_v48 = vpop.eup %7188  ;;  %7206 = vrcp.f32 %v5164_v51  ;;  %v5165_v50 = vadd.f32 1.0, %v7187_v20  ;;  %v5891_v46 = vmul.f32 -1.442695, %v8553_v61  ;;  %v8563_v31 = vadd.f32 %v8411_v7, %v4926_v15 }
 0x272   : > { %v6373_v57 = vpop.f32.mrb[26].mxu1  ;;  %7208 = vrcp.f32 %v5162_v24  ;;  %v5163_v56 = vadd.f32 1.0, %v7189_v48  ;;  %v5889_v36 = vmul.f32 -1.442695, %v8558_v19  ;;  %v8567_v43 = vadd.f32 %v8411_v7, %v4924_v59  ;;  %v6572_v26 = vpop.f32.mrb[24].mxu0 }
 0x273   : > { %v2714_v4 = vpop.f32.mrb[27].mxu1  ;;  %v7191_v30 = vpop.eup %7190  ;;  %7210 = vrcp.f32 %v5165_v50  ;;  %v5892_v37 = vmul.f32 -1.442695, %v8563_v31  ;;  %v6620_v34 = vadd.f32 %v6572_v26, %v6372_v17 }
 0x274   : > { %v4753_v2 = vpop.f32.mrb[25].mxu0  ;;  %v7193_v33 = vpop.eup %7192  ;;  %v5304_v38 = vmul.f32 %v7191_v30, %v8460_v55  ;;  %7212 = vrcp.f32 %v5163_v56  ;;  %v5890_v1 = vmul.f32 -1.442695, %v8567_v43 }
 0x275   : > { %v6621_v6 = vadd.f32 %v4753_v2, %v2711_v18  ;;  %v6573_v54 = vpop.f32.mrb[26].mxu0  ;;  %v7195_v29 = vpop.eup %7194  ;;  %v5302_v3 = vmul.f32 %v7193_v33, %v8464_v21  ;;  %7214 = vpow2.f32 %v5891_v46  ;;  %v4929_v32 = vmul.f32 %v6620_v34, %v8406_v44 }
 0x276   : > { %v6622_v16 = vadd.f32 %v6573_v54, %v6373_v57  ;;  %v4756_v39 = vpop.f32.mrb[27].mxu0  ;;  %v7197_v8 = vpop.eup %7196  ;;  %5352 = vst [vmem:[%s8499_s27 + $0x50] sm:$0xff] %v5304_v38  ;;  %v5305_v12 = vmul.f32 %v7195_v29, %v8469_v28  ;;  %7216 = vpow2.f32 %v5889_v36 }
 0x277   : > { %v4927_v55 = vmul.f32 %v6621_v6, %v8406_v44  ;;  %v6623_v42 = vadd.f32 %v4756_v39, %v2714_v4  ;;  %v7199_v45 = vpop.eup %7198  ;;  %5350 = vst [vmem:[%s8499_s27 + $0x40] sm:$0xff] %v5302_v3  ;;  %v5303_v41 = vmul.f32 %v7197_v8, %v8473_v22  ;;  %7218 = vpow2.f32 %v5892_v37 }
 0x278   : > { %v8580_v21 = vadd.f32 %v8411_v7, %v4929_v32  ;;  %v4930_v52 = vmul.f32 %v6622_v16, %v8406_v44  ;;  %v6376_v23 = vpop.f32.mrb[28].mxu1  ;;  %v7201_v40 = vpop.eup %7200  ;;  %5353 = vst [vmem:[%s8499_s27 + $0x58] sm:$0xff] %v5305_v12  ;;  %v5168_v5 = vadd.f32 1.0, %v7199_v45  ;;  %7220 = vpow2.f32 %v5890_v1 }
 0x279   : > { %v8585_v28 = vadd.f32 %v8411_v7, %v4927_v55  ;;  %v4928_v13 = vmul.f32 %v6623_v42, %v8406_v44  ;;  %v2727_v14 = vpop.f32.mrb[29].mxu1  ;;  %v7203_v25 = vpop.eup %7202  ;;  %5351 = vst [vmem:[%s8499_s27 + $0x48] sm:$0xff] %v5303_v41  ;;  %v5166_v22 = vadd.f32 1.0, %v7201_v40 }
 0x27a   : > { %v5895_v49 = vmul.f32 -1.442695, %v8580_v21  ;;  %v8591_v47 = vadd.f32 %v8411_v7, %v4930_v52  ;;  %v6377_v53 = vpop.f32.mrb[30].mxu1  ;;  %v7205_v60 = vpop.eup %7204  ;;  %7222 = vrcp.f32 %v5168_v5  ;;  %v5169_v27 = vadd.f32 1.0, %v7203_v25 }
 0x27b   : > { %v5893_v51 = vmul.f32 -1.442695, %v8585_v28  ;;  %v8595_v15 = vadd.f32 %v8411_v7, %v4928_v13  ;;  %v6576_v17 = vpop.f32.mrb[28].mxu0  ;;  %v2730_v20 = vpop.f32.mrb[31].mxu1  ;;  %7224 = vrcp.f32 %v5166_v22  ;;  %v5167_v59 = vadd.f32 1.0, %v7205_v60 }
 0x27c   : > { %v7207_v24 = vpop.eup %7206  ;;  %v5896_v18 = vmul.f32 -1.442695, %v8591_v47  ;;  %v6624_v48 = vadd.f32 %v6576_v17, %v6376_v23  ;;  %v4769_v50 = vpop.f32.mrb[29].mxu0  ;;  %7226 = vrcp.f32 %v5169_v27 }
 0x27d   : > { %v7209_v46 = vpop.eup %7208  ;;  %v5308_v57 = vmul.f32 %v7207_v24, %v8485_v63  ;;  %v5894_v56 = vmul.f32 -1.442695, %v8595_v15  ;;  %v6625_v36 = vadd.f32 %v4769_v50, %v2727_v14  ;;  %v6577_v26 = vpop.f32.mrb[30].mxu0  ;;  %7228 = vrcp.f32 %v5167_v59 }
 0x27e   : > { %v7211_v4 = vpop.eup %7210  ;;  %v5306_v30 = vmul.f32 %v7209_v46, %v8489_v9  ;;  %v4933_v37 = vmul.f32 %v6624_v48, %v8406_v44  ;;  %v6626_v34 = vadd.f32 %v6577_v26, %v6377_v53  ;;  %v4772_v2 = vpop.f32.mrb[31].mxu0  ;;  %7230 = vpow2.f32 %v5895_v49 }
 0x27f   : > { %v7213_v33 = vpop.eup %7212  ;;  %5356 = vst [vmem:[%s8499_s27 + $0x70] sm:$0xff] %v5308_v57  ;;  %v5309_v38 = vmul.f32 %v7211_v4, %v8494_v10  ;;  %v4931_v63 = vmul.f32 %v6625_v36, %v8406_v44  ;;  %v6627_v1 = vadd.f32 %v4772_v2, %v2730_v20  ;;  %7232 = vpow2.f32 %v5893_v51 }
 0x280   : > { %v7215_v6 = vpop.eup %7214  ;;  %5354 = vst [vmem:[%s8499_s27 + $0x60] sm:$0xff] %v5306_v30  ;;  %v5307_v54 = vmul.f32 %v7213_v33, %v8503_v62  ;;  %v8608_v9 = vadd.f32 %v8411_v7, %v4933_v37  ;;  %v4934_v29 = vmul.f32 %v6626_v34, %v8406_v44  ;;  %v6380_v3 = vpop.f32.mrb[32].mxu1  ;;  %7234 = vpow2.f32 %v5896_v18 }
 0x281   : > { %v7217_v32 = vpop.eup %7216  ;;  %5357 = vst [vmem:[%s8499_s27 + $0x78] sm:$0xff] %v5309_v38  ;;  %v5172_v16 = vadd.f32 1.0, %v7215_v6  ;;  %v8613_v10 = vadd.f32 %v8411_v7, %v4931_v63  ;;  %v4932_v39 = vmul.f32 %v6627_v1, %v8406_v44  ;;  %v2743_v8 = vpop.f32.mrb[33].mxu1  ;;  %7236 = vpow2.f32 %v5894_v56 }
 0x282   : > { %v7219_v12 = vpop.eup %7218  ;;  %5355 = vst [vmem:[%s8499_s27 + $0x68] sm:$0xff] %v5307_v54  ;;  %v5170_v62 = vadd.f32 1.0, %v7217_v32  ;;  %v8618_v55 = vadd.f32 %v8411_v7, %v4934_v29  ;;  %v6381_v42 = vpop.f32.mrb[34].mxu1  ;;  %v5899_v52 = vmul.f32 -1.442695, %v8608_v9 }
 0x283   : > { %v7221_v45 = vpop.eup %7220  ;;  %7238 = vrcp.f32 %v5172_v16  ;;  %v5173_v41 = vadd.f32 1.0, %v7219_v12  ;;  %v8622_v23 = vadd.f32 %v8411_v7, %v4932_v39  ;;  %v6580_v40 = vpop.f32.mrb[32].mxu0  ;;  %v5897_v14 = vmul.f32 -1.442695, %v8613_v10 }
 0x284   : > { %v2746_v5 = vpop.f32.mrb[35].mxu1  ;;  %7240 = vrcp.f32 %v5170_v62  ;;  %v5171_v13 = vadd.f32 1.0, %v7221_v45  ;;  %v6628_v25 = vadd.f32 %v6580_v40, %v6380_v3  ;;  %v4785_v22 = vpop.f32.mrb[33].mxu0  ;;  %v5900_v53 = vmul.f32 -1.442695, %v8618_v55 }
 0x285   : > { %v7223_v49 = vpop.eup %7222  ;;  %7242 = vrcp.f32 %v5173_v41  ;;  %v5898_v60 = vmul.f32 -1.442695, %v8622_v23  ;;  %v6629_v27 = vadd.f32 %v4785_v22, %v2743_v8  ;;  %v6581_v51 = vpop.f32.mrb[34].mxu0 }
 0x286   : > { %v7225_v17 = vpop.eup %7224  ;;  %v5312_v20 = vmul.f32 %v7223_v49, %v8521_v0  ;;  %7244 = vrcp.f32 %v5171_v13  ;;  %v4937_v24 = vmul.f32 %v6628_v25, %v8406_v44  ;;  %v6630_v59 = vadd.f32 %v6581_v51, %v6381_v42  ;;  %v4788_v18 = vpop.f32.mrb[35].mxu0 }
 0x287   : > { %v7227_v48 = vpop.eup %7226  ;;  %v5310_v50 = vmul.f32 %v7225_v17, %v8526_v58  ;;  %7246 = vpow2.f32 %v5899_v52  ;;  %v4935_v46 = vmul.f32 %v6629_v27, %v8406_v44  ;;  %v6631_v57 = vadd.f32 %v4788_v18, %v2746_v5 }
 0x288   : > { %v7229_v56 = vpop.eup %7228  ;;  %5360 = vst [vmem:[%s8499_s27 + $0x90] sm:$0xff] %v5312_v20  ;;  %v5313_v36 = vmul.f32 %v7227_v48, %v8531_v11  ;;  %7248 = vpow2.f32 %v5897_v14  ;;  %v8634_v0 = vadd.f32 %v8411_v7, %v4937_v24  ;;  %v4938_v26 = vmul.f32 %v6630_v59, %v8406_v44  ;;  %v6384_v4 = vpop.f32.mrb[36].mxu1 }
 0x289   : > { %v7231_v30 = vpop.eup %7230  ;;  %5358 = vst [vmem:[%s8499_s27 + $0x80] sm:$0xff] %v5310_v50  ;;  %v5311_v58 = vmul.f32 %v7229_v56, %v8535_v35  ;;  %7250 = vpow2.f32 %v5900_v53  ;;  %v8640_v37 = vadd.f32 %v8411_v7, %v4935_v46  ;;  %v4936_v34 = vmul.f32 %v6631_v57, %v8406_v44  ;;  %v2759_v2 = vpop.f32.mrb[37].mxu1 }
 0x28a   : > { %v7233_v11 = vpop.eup %7232  ;;  %5361 = vst [vmem:[%s8499_s27 + $0x98] sm:$0xff] %v5313_v36  ;;  %v5176_v33 = vadd.f32 1.0, %v7231_v30  ;;  %7252 = vpow2.f32 %v5898_v60  ;;  %v5903_v38 = vmul.f32 -1.442695, %v8634_v0  ;;  %v8646_v63 = vadd.f32 %v8411_v7, %v4938_v26  ;;  %v6385_v1 = vpop.f32.mrb[38].mxu1 }
 0x28b   : > { %v7235_v6 = vpop.eup %7234  ;;  %5359 = vst [vmem:[%s8499_s27 + $0x88] sm:$0xff] %v5311_v58  ;;  %v5174_v35 = vadd.f32 1.0, %v7233_v11  ;;  %v5901_v54 = vmul.f32 -1.442695, %v8640_v37  ;;  %v8651_v29 = vadd.f32 %v8411_v7, %v4936_v34  ;;  %v6584_v3 = vpop.f32.mrb[36].mxu0 }
 0x28c   : > { %v2762_v32 = vpop.f32.mrb[39].mxu1  ;;  %v7237_v16 = vpop.eup %7236  ;;  %7254 = vrcp.f32 %v5176_v33  ;;  %v5177_v39 = vadd.f32 1.0, %v7235_v6  ;;  %v5904_v8 = vmul.f32 -1.442695, %v8646_v63  ;;  %v6632_v12 = vadd.f32 %v6584_v3, %v6384_v4 }
 0x28d   : > { %v4801_v62 = vpop.f32.mrb[37].mxu0  ;;  %v7239_v42 = vpop.eup %7238  ;;  %7256 = vrcp.f32 %v5174_v35  ;;  %v5175_v45 = vadd.f32 1.0, %v7237_v16  ;;  %v5902_v41 = vmul.f32 -1.442695, %v8651_v29 }
 0x28e   : > { %v6633_v52 = vadd.f32 %v4801_v62, %v2759_v2  ;;  %v6585_v40 = vpop.f32.mrb[38].mxu0  ;;  %v7241_v5 = vpop.eup %7240  ;;  %v5316_v13 = vmul.f32 %v7239_v42, %v8553_v61  ;;  %7258 = vrcp.f32 %v5177_v39  ;;  %v4941_v14 = vmul.f32 %v6632_v12, %v8406_v44 }
 0x28f   : > { %v6634_v25 = vadd.f32 %v6585_v40, %v6385_v1  ;;  %v4804_v22 = vpop.f32.mrb[39].mxu0  ;;  %v7243_v49 = vpop.eup %7242  ;;  %v5314_v53 = vmul.f32 %v7241_v5, %v8558_v19  ;;  %7260 = vrcp.f32 %v5175_v45 }
 0x290   : > { %v4939_v60 = vmul.f32 %v6633_v52, %v8406_v44  ;;  %v6635_v27 = vadd.f32 %v4804_v22, %v2762_v32  ;;  %v7245_v51 = vpop.eup %7244  ;;  %5364 = vst [vmem:[%s8499_s27 + $0xb0] sm:$0xff] %v5316_v13  ;;  %v5317_v17 = vmul.f32 %v7243_v49, %v8563_v31  ;;  %7262 = vpow2.f32 %v5903_v38  ;;  %v6388_v24 = vpop.f32.mrb[40].mxu1 }
 0x291   : > { %v8662_v61 = vadd.f32 %v8411_v7, %v4941_v14  ;;  %v4942_v20 = vmul.f32 %v6634_v25, %v8406_v44  ;;  %v7247_v59 = vpop.eup %7246  ;;  %5362 = vst [vmem:[%s8499_s27 + $0xa0] sm:$0xff] %v5314_v53  ;;  %v5315_v19 = vmul.f32 %v7245_v51, %v8567_v43  ;;  %7264 = vpow2.f32 %v5901_v54  ;;  %v2775_v50 = vpop.f32.mrb[41].mxu1 }
 0x292   : > { %v8668_v18 = vadd.f32 %v8411_v7, %v4939_v60  ;;  %v4940_v48 = vmul.f32 %v6635_v27, %v8406_v44  ;;  %v7249_v31 = vpop.eup %7248  ;;  %5365 = vst [vmem:[%s8499_s27 + $0xb8] sm:$0xff] %v5317_v17  ;;  %v5180_v46 = vadd.f32 1.0, %v7247_v59  ;;  %7266 = vpow2.f32 %v5904_v8  ;;  %v6389_v56 = vpop.f32.mrb[42].mxu1 }
 0x293   : > { %v8673_v57 = vadd.f32 %v8411_v7, %v4942_v20  ;;  %v7251_v36 = vpop.eup %7250  ;;  %5363 = vst [vmem:[%s8499_s27 + $0xa8] sm:$0xff] %v5315_v19  ;;  %v5178_v26 = vadd.f32 1.0, %v7249_v31  ;;  %7268 = vpow2.f32 %v5902_v41  ;;  %v5907_v43 = vmul.f32 -1.442695, %v8662_v61  ;;  %v6588_v30 = vpop.f32.mrb[40].mxu0 }
 0x294   : > { %v8678_v4 = vadd.f32 %v8411_v7, %v4940_v48  ;;  %v2778_v58 = vpop.f32.mrb[43].mxu1  ;;  %v7253_v34 = vpop.eup %7252  ;;  %7270 = vrcp.f32 %v5180_v46  ;;  %v5181_v2 = vadd.f32 1.0, %v7251_v36  ;;  %v5905_v11 = vmul.f32 -1.442695, %v8668_v18 }
 0x295   : > { %v6636_v33 = vadd.f32 %v6588_v30, %v6388_v24  ;;  %v4817_v38 = vpop.f32.mrb[41].mxu0  ;;  %7272 = vrcp.f32 %v5178_v26  ;;  %v5179_v1 = vadd.f32 1.0, %v7253_v34  ;;  %v5908_v6 = vmul.f32 -1.442695, %v8673_v57 }
 0x296   : > { %v6637_v35 = vadd.f32 %v4817_v38, %v2775_v50  ;;  %v6589_v54 = vpop.f32.mrb[42].mxu0  ;;  %v7255_v3 = vpop.eup %7254  ;;  %7274 = vrcp.f32 %v5181_v2  ;;  %v5906_v32 = vmul.f32 -1.442695, %v8678_v4 }
 0x297   : > { %v4945_v16 = vmul.f32 %v6636_v33, %v8406_v44  ;;  %v6638_v39 = vadd.f32 %v6589_v54, %v6389_v56  ;;  %v4820_v8 = vpop.f32.mrb[43].mxu0  ;;  %v7257_v12 = vpop.eup %7256  ;;  %v5320_v62 = vmul.f32 %v7255_v3, %v8580_v21  ;;  %7276 = vrcp.f32 %v5179_v1 }
 0x298   : > { %v4943_v42 = vmul.f32 %v6637_v35, %v8406_v44  ;;  %v6639_v45 = vadd.f32 %v4820_v8, %v2778_v58  ;;  %v7259_v41 = vpop.eup %7258  ;;  %v5318_v52 = vmul.f32 %v7257_v12, %v8585_v28  ;;  %7278 = vpow2.f32 %v5907_v43  ;;  %v6392_v13 = vpop.f32.mrb[44].mxu1 }
 0x299   : > { %v8688_v40 = vadd.f32 %v8411_v7, %v4945_v16  ;;  %v4946_v5 = vmul.f32 %v6638_v39, %v8406_v44  ;;  %v7261_v14 = vpop.eup %7260  ;;  %5368 = vst [vmem:[%s8499_s27 + $0xd0] sm:$0xff] %v5320_v62  ;;  %v5321_v21 = vmul.f32 %v7259_v41, %v8591_v47  ;;  %7280 = vpow2.f32 %v5905_v11  ;;  %v2791_v49 = vpop.f32.mrb[45].mxu1 }
 0x29a   : > { %v8694_v25 = vadd.f32 %v8411_v7, %v4943_v42  ;;  %v4944_v22 = vmul.f32 %v6639_v45, %v8406_v44  ;;  %v7263_v28 = vpop.eup %7262  ;;  %5366 = vst [vmem:[%s8499_s27 + $0xc0] sm:$0xff] %v5318_v52  ;;  %v5319_v53 = vmul.f32 %v7261_v14, %v8595_v15  ;;  %7282 = vpow2.f32 %v5908_v6  ;;  %v6393_v51 = vpop.f32.mrb[46].mxu1 }
 0x29b   : > { %v5911_v60 = vmul.f32 -1.442695, %v8688_v40  ;;  %v8701_v27 = vadd.f32 %v8411_v7, %v4946_v5  ;;  %v7265_v47 = vpop.eup %7264  ;;  %5369 = vst [vmem:[%s8499_s27 + $0xd8] sm:$0xff] %v5321_v21  ;;  %v5184_v17 = vadd.f32 1.0, %v7263_v28  ;;  %7284 = vpow2.f32 %v5906_v32  ;;  %v6592_v59 = vpop.f32.mrb[44].mxu0 }
 0x29c   : > { %v5909_v20 = vmul.f32 -1.442695, %v8694_v25  ;;  %v8706_v24 = vadd.f32 %v8411_v7, %v4944_v22  ;;  %v2794_v19 = vpop.f32.mrb[47].mxu1  ;;  %v7267_v48 = vpop.eup %7266  ;;  %5367 = vst [vmem:[%s8499_s27 + $0xc8] sm:$0xff] %v5319_v53  ;;  %v5182_v15 = vadd.f32 1.0, %v7265_v47  ;;  %v6640_v31 = vadd.f32 %v6592_v59, %v6392_v13 }
 0x29d   : > { %7286 = vpow2.f32 %v5911_v60  ;;  %v5912_v50 = vmul.f32 -1.442695, %v8701_v27  ;;  %v4833_v46 = vpop.f32.mrb[45].mxu0  ;;  %v7269_v56 = vpop.eup %7268  ;;  %v5185_v36 = vadd.f32 1.0, %v7267_v48 }
 0x29e   : > { %7288 = vrcp.f32 %v5184_v17  ;;  %v5910_v26 = vmul.f32 -1.442695, %v8706_v24  ;;  %v6641_v43 = vadd.f32 %v4833_v46, %v2791_v49  ;;  %v6593_v30 = vpop.f32.mrb[46].mxu0  ;;  %v7271_v58 = vpop.eup %7270  ;;  %v5183_v34 = vadd.f32 1.0, %v7269_v56 }
 0x29f   : > { %7290 = vrcp.f32 %v5182_v15  ;;  %v4949_v2 = vmul.f32 %v6640_v31, %v8406_v44  ;;  %v6642_v11 = vadd.f32 %v6593_v30, %v6393_v51  ;;  %v4836_v33 = vpop.f32.mrb[47].mxu0  ;;  %v7273_v38 = vpop.eup %7272  ;;  %v5324_v1 = vmul.f32 %v7271_v58, %v8608_v9 }
 0x2a0   : > { %7292 = vrcp.f32 %v5185_v36  ;;  %v4947_v6 = vmul.f32 %v6641_v43, %v8406_v44  ;;  %v6643_v35 = vadd.f32 %v4836_v33, %v2794_v19  ;;  %v7275_v54 = vpop.eup %7274  ;;  %v5322_v3 = vmul.f32 %v7273_v38, %v8613_v10 }
 0x2a1   : > { %7294 = vrcp.f32 %v5183_v34  ;;  %v8716_v32 = vadd.f32 %v8411_v7, %v4949_v2  ;;  %v4950_v16 = vmul.f32 %v6642_v11, %v8406_v44  ;;  %v7277_v39 = vpop.eup %7276  ;;  %5372 = vst [vmem:[%s8499_s27 + $0xf0] sm:$0xff] %v5324_v1  ;;  %v5325_v8 = vmul.f32 %v7275_v54, %v8618_v55 }
 0x2a2   : > { %7296 = vpow2.f32 %v5909_v20  ;;  %v4948_v9 = vmul.f32 %v6643_v35, %v8406_v44  ;;  %v7279_v12 = vpop.eup %7278  ;;  %5370 = vst [vmem:[%s8499_s27 + $0xe0] sm:$0xff] %v5322_v3  ;;  %v5323_v62 = vmul.f32 %v7277_v39, %v8622_v23  ;;  %v8726_v42 = vadd.f32 %v8411_v7, %v4947_v6  ;;  %v7357_v23 = vld [vmem:[%s8785_s3] ss:$0 sm:$0xff] }
 0x2a3   : > { %7298 = vpow2.f32 %v5912_v50  ;;  %v5915_v10 = vmul.f32 -1.442695, %v8716_v32  ;;  %v7281_v45 = vpop.eup %7280  ;;  %5373 = vst [vmem:[%s8499_s27 + $0xf8] sm:$0xff] %v5325_v8  ;;  %v5188_v41 = vadd.f32 1.0, %v7279_v12  ;;  %v8730_v52 = vadd.f32 %v8411_v7, %v4950_v16 }
 0x2a4   : > { %7300 = vpow2.f32 %v5910_v26  ;;  %v7283_v55 = vpop.eup %7282  ;;  %5371 = vst [vmem:[%s8499_s27 + $0xe8] sm:$0xff] %v5323_v62  ;;  %v5186_v44 = vadd.f32 1.0, %v7281_v45  ;;  %v8736_v5 = vadd.f32 %v7357_v23, %v4948_v9  ;;  %v5913_v7 = vmul.f32 -1.442695, %v8726_v42 }
 0x2a5   : > { %7302 = vpow2.f32 %v5915_v10  ;;  %v7285_v13 = vpop.eup %7284  ;;  %v5189_v14 = vadd.f32 1.0, %v7283_v55  ;;  %v5916_v53 = vmul.f32 -1.442695, %v8730_v52 }
 0x2a6   : > { %7304 = vrcp.f32 %v5188_v41  ;;  %v5187_v22 = vadd.f32 1.0, %v7285_v13  ;;  %v5914_v47 = vmul.f32 -1.442695, %v8736_v5 }
 0x2a7   : > { %v7287_v21 = vpop.eup %7286  ;;  %7306 = vrcp.f32 %v5186_v44 }
 0x2a8   : > { %v7289_v49 = vpop.eup %7288  ;;  %7308 = vrcp.f32 %v5189_v14  ;;  %v5192_v28 = vadd.f32 1.0, %v7287_v21 }
 0x2a9   : > { %v7291_v60 = vpop.eup %7290  ;;  %v5328_v51 = vmul.f32 %v7289_v49, %v8634_v0  ;;  %7310 = vrcp.f32 %v5187_v22 }
 0x2aa   : > { %v7293_v17 = vpop.eup %7292  ;;  %v5326_v20 = vmul.f32 %v7291_v60, %v8640_v37  ;;  %7312 = vrcp.f32 %v5192_v28 }
 0x2ab   : > { %v7295_v59 = vpop.eup %7294  ;;  %5376 = vst [vmem:[%s8499_s27 + $0x110] sm:$0xff] %v5328_v51  ;;  %v5329_v19 = vmul.f32 %v7293_v17, %v8646_v63  ;;  %7314 = vpow2.f32 %v5913_v7 }
 0x2ac   : > { %v7297_v48 = vpop.eup %7296  ;;  %5374 = vst [vmem:[%s8499_s27 + $0x100] sm:$0xff] %v5326_v20  ;;  %v5327_v15 = vmul.f32 %v7295_v59, %v8651_v29  ;;  %7316 = vpow2.f32 %v5916_v53 }
 0x2ad   : > { %v7299_v50 = vpop.eup %7298  ;;  %5377 = vst [vmem:[%s8499_s27 + $0x118] sm:$0xff] %v5329_v19  ;;  %v5190_v0 = vadd.f32 1.0, %v7297_v48  ;;  %7318 = vpow2.f32 %v5914_v47 }
 0x2ae   : > { %v7301_v31 = vpop.eup %7300  ;;  %5375 = vst [vmem:[%s8499_s27 + $0x108] sm:$0xff] %v5327_v15  ;;  %v5193_v46 = vadd.f32 1.0, %v7299_v50 }
 0x2af   : > { %v7303_v37 = vpop.eup %7302  ;;  %7320 = vrcp.f32 %v5190_v0  ;;  %v5191_v56 = vadd.f32 1.0, %v7301_v31 }
 0x2b0   : > { %v7305_v36 = vpop.eup %7304  ;;  %7322 = vrcp.f32 %v5193_v46  ;;  %v5196_v63 = vadd.f32 1.0, %v7303_v37 }
 0x2b1   : > { %v7307_v26 = vpop.eup %7306  ;;  %v5332_v29 = vmul.f32 %v7305_v36, %v8662_v61  ;;  %7324 = vrcp.f32 %v5191_v56 }
 0x2b2   : > { %v7309_v43 = vpop.eup %7308  ;;  %v5330_v30 = vmul.f32 %v7307_v26, %v8668_v18  ;;  %7326 = vrcp.f32 %v5196_v63 }
 0x2b3   : > { %v7311_v58 = vpop.eup %7310  ;;  %5380 = vst [vmem:[%s8499_s27 + $0x130] sm:$0xff] %v5332_v29  ;;  %v5333_v34 = vmul.f32 %v7309_v43, %v8673_v57 }
 0x2b4   : > { %v7313_v2 = vpop.eup %7312  ;;  %5378 = vst [vmem:[%s8499_s27 + $0x120] sm:$0xff] %v5330_v30  ;;  %v5331_v11 = vmul.f32 %v7311_v58, %v8678_v4 }
 0x2b5   : > { %v7315_v33 = vpop.eup %7314  ;;  %5381 = vst [vmem:[%s8499_s27 + $0x138] sm:$0xff] %v5333_v34  ;;  %v5336_v38 = vmul.f32 %v7313_v2, %v8688_v40 }
 0x2b6   : > { %v7317_v1 = vpop.eup %7316  ;;  %5379 = vst [vmem:[%s8499_s27 + $0x128] sm:$0xff] %v5331_v11  ;;  %v5194_v61 = vadd.f32 1.0, %v7315_v33 }
 0x2b7   : > { %v7319_v6 = vpop.eup %7318  ;;  %5384 = vst [vmem:[%s8499_s27 + $0x150] sm:$0xff] %v5336_v38  ;;  %v5197_v18 = vadd.f32 1.0, %v7317_v1 }
 0x2b8   : > { %7328 = vrcp.f32 %v5194_v61  ;;  %v5195_v57 = vadd.f32 1.0, %v7319_v6 }
 0x2b9   : > { %v7321_v35 = vpop.eup %7320  ;;  %7330 = vrcp.f32 %v5197_v18 }
 0x2ba   : > { %v7323_v54 = vpop.eup %7322  ;;  %v5334_v4 = vmul.f32 %v7321_v35, %v8694_v25  ;;  %7332 = vrcp.f32 %v5195_v57 }
 0x2bb   : > { %v7325_v40 = vpop.eup %7324  ;;  %v5337_v3 = vmul.f32 %v7323_v54, %v8701_v27 }
 0x2bc   : > { %v7327_v16 = vpop.eup %7326  ;;  %5382 = vst [vmem:[%s8499_s27 + $0x140] sm:$0xff] %v5334_v4  ;;  %v5335_v39 = vmul.f32 %v7325_v40, %v8706_v24 }
 0x2bd   : > { %5385 = vst [vmem:[%s8499_s27 + $0x158] sm:$0xff] %v5337_v3  ;;  %v5340_v8 = vmul.f32 %v7327_v16, %v8716_v32 }
 0x2be   : > { %5383 = vst [vmem:[%s8499_s27 + $0x148] sm:$0xff] %v5335_v39 }
 0x2bf   : > { %5388 = vst [vmem:[%s8499_s27 + $0x170] sm:$0xff] %v5340_v8 }
 0x2c2   : > { %v7329_v9 = vpop.eup %7328 }
 0x2c3   : > { %v7331_v12 = vpop.eup %7330  ;;  %v5338_v25 = vmul.f32 %v7329_v9, %v8726_v42 }
 0x2c4   : > { %v7333_v62 = vpop.eup %7332  ;;  %v5341_v10 = vmul.f32 %v7331_v12, %v8730_v52 }
 0x2c5   : > { %5386 = vst [vmem:[%s8499_s27 + $0x160] sm:$0xff] %v5338_v25  ;;  %v5339_v27 = vmul.f32 %v7333_v62, %v8736_v5 }
 0x2c6   : > { %5389 = vst [vmem:[%s8499_s27 + $0x178] sm:$0xff] %v5341_v10 }
 0x2c7   : > { %5387 = vst [vmem:[%s8499_s27 + $0x168] sm:$0xff] %v5339_v27 }
 0x2c8 PF: > { %s14_s17 = sadd.s32 1, %s7380_s17   ;;  %s8787_s15 = smov %s7376_s16 }
 0x2c9   : > { %p11_p5 = scmp.ge.s32.totalorder %s14_s17, 4   ;;  %s8788_s16 = smov %s8790_s18 }
 0x2cb   :  { %13 = sbr.rel (!%p11_p5) target bundleno = 2 (0x2), region = 83 }

</bundles_post_ra>
